<compile_context>
chip_gen: v7x
topology: tpu7x:2x2x1
jax: 0.10.0
libtpu: 0.0.40
codegen_flags: <defaults>
</compile_context>

<pallas_src>
import functools

import jax
import jax.numpy as jnp
from jax import lax
from jax.experimental import pallas as pl
from jax.experimental.pallas import tpu as pltpu


# ----------------------------------------------------------------------------
# Encoder kernel (grid=(S,)): one GRU step per grid iteration.
# Streams pre-embedded source (1,B,E) in and encoder state (1,B,H) out; the
# final hidden is a constant-index accumulator output that doubles as the
# recurrence carry. Packed-sequence semantics via a per-step validity mask.
# ----------------------------------------------------------------------------
def encoder_kernel(xemb_ref,     # (1, B, E)  f32  streamed source embedding
                   valid_ref,    # (1, B, 1)  f32  1 = position < length
                   wih_ref,      # (E, 3H)    f32
                   whh_ref,      # (H, 3H)    f32
                   bih_ref,      # (1, 3H)    f32
                   bhh_ref,      # (1, 3H)    f32
                   enc_out_ref,  # (1, B, H)  f32  streamed out
                   hfin_ref):    # (B, H)     f32  resident accumulator / carry
    s = pl.program_id(0)
    H = whh_ref.shape[0]

    @pl.when(s == 0)
    def _():
        hfin_ref[...] = jnp.zeros_like(hfin_ref)

    h = hfin_ref[...]
    x = xemb_ref[0]                                              # (B, E)
    m = valid_ref[0]                                             # (B, 1)

    gx = jnp.dot(x, wih_ref[...], preferred_element_type=jnp.float32) + bih_ref[...]
    gh = jnp.dot(h, whh_ref[...], preferred_element_type=jnp.float32) + bhh_ref[...]
    r = jax.nn.sigmoid(gx[:, :H] + gh[:, :H])
    z = jax.nn.sigmoid(gx[:, H:2 * H] + gh[:, H:2 * H])
    n = jnp.tanh(gx[:, 2 * H:] + r * gh[:, 2 * H:])
    h_new = (1.0 - z) * n + z * h

    valid = m > 0.0
    enc_out_ref[0] = jnp.where(valid, h_new, 0.0)                # pad -> 0
    hfin_ref[...] = jnp.where(valid, h_new, h)                   # hold hidden


# ----------------------------------------------------------------------------
# Decoder kernel (grid=(T,)): step t==0 initializes the recurrent scratch and
# the hoisted encoder-side attention projection; steps t>=1 run attention,
# the GRU cell (fused input weights), the fused output projection, the
# first-max argmax, and choose the next input (teacher forcing flag in SMEM).
# ----------------------------------------------------------------------------
def decoder_kernel(enc_ref,      # (S, B, H)    f32  encoder outputs (resident)
                   mask_ref,     # (S, B, 1)    f32  source mask (resident)
                   tgt_ref,      # (1, B, E)    f32  streamed target embedding
                   h0_ref,       # (B, H)       f32  initial decoder hidden
                   flags_ref,    # (T,)         i32  teacher-forcing flags (SMEM)
                   emb_ref,      # (Vt, E)      f32  decoder embedding table
                   wah_ref,      # (H, A)       f32  attention W (hidden part)
                   wae_ref,      # (H, A)       f32  attention W (encoder part)
                   battn_ref,    # (1, A)       f32
                   vrow_ref,     # (1, A)       f32  attention v (row vector)
                   wix_ref,      # (E+H, 3H)    f32  fused GRU W_ih [emb; ctx]
                   whh_ref,      # (H, 3H)      f32
                   bih_ref,      # (1, 3H)      f32
                   bhh_ref,      # (1, 3H)      f32
                   wout_ref,     # (2H+E, Vt)   f32  fused W_out [h; ctx; emb]
                   bout_ref,     # (1, Vt)      f32  (padded cols = -1e30)
                   out_ref,      # (1, B, Vt)   f32  streamed logits out
                   pred_ref,     # (1, B, 1)    i32  streamed argmax out
                   h_scr,        # (B, H)       f32  hidden carry
                   x_scr,        # (B, E)       f32  next-input embedding carry
                   eproj_scr):   # (S, B, A)    f32  hoisted enc @ W_enc + b
    t = pl.program_id(0)
    S, B, H = enc_ref.shape
    A = wah_ref.shape[1]
    Vt = out_ref.shape[2]

    @pl.when(t == 0)
    def _init():
        h_scr[...] = h0_ref[...]
        x_scr[...] = tgt_ref[0]                                  # emb(target[:,0])
        eproj = (jnp.dot(enc_ref[...].reshape(S * B, H), wae_ref[...],
                         preferred_element_type=jnp.float32)
                 + battn_ref[...])
        eproj_scr[...] = eproj.reshape(S, B, A)
        out_ref[0] = jnp.zeros((B, Vt), jnp.float32)             # outputs[:,0] = 0
        pred_ref[0] = jnp.zeros((B, 1), jnp.int32)

    @pl.when(t > 0)
    def _step():
        hidden = h_scr[...]                                      # (B, H)
        inp = x_scr[...]                                         # (B, E)

        # --- additive attention over source positions ---
        hq = jnp.dot(hidden, wah_ref[...],
                     preferred_element_type=jnp.float32)         # (B, A)
        energy = jnp.tanh(eproj_scr[...] + hq[None, :, :])       # (S, B, A)
        score = jnp.sum(energy * vrow_ref[...], axis=-1,
                        keepdims=True)                           # (S, B, 1) XLU
        score = jnp.where(mask_ref[...] > 0.0, score, jnp.float32(-1e9))
        score = score - jnp.max(score, axis=0, keepdims=True)
        e = jnp.exp(score)
        inv = pl.reciprocal(jnp.sum(e, axis=0, keepdims=True), approx=True)
        ctx = jnp.sum((e * inv) * enc_ref[...], axis=0)          # (B, H)

        # --- GRU cell on [emb ; ctx] via fused input weights ---
        gx = (jnp.dot(jnp.concatenate([inp, ctx], axis=-1), wix_ref[...],
                      preferred_element_type=jnp.float32) + bih_ref[...])
        gh = jnp.dot(hidden, whh_ref[...],
                     preferred_element_type=jnp.float32) + bhh_ref[...]
        r = jax.nn.sigmoid(gx[:, :H] + gh[:, :H])
        z = jax.nn.sigmoid(gx[:, H:2 * H] + gh[:, H:2 * H])
        n = jnp.tanh(gx[:, 2 * H:] + r * gh[:, 2 * H:])
        h_new = (1.0 - z) * n + z * hidden                       # (B, H)

        # --- fused output projection on [h_new ; ctx ; emb] ---
        logits = (jnp.dot(jnp.concatenate([h_new, ctx, inp], axis=-1),
                          wout_ref[...], preferred_element_type=jnp.float32)
                  + bout_ref[...])                               # (B, Vt)
        out_ref[0] = logits

        # --- first-max argmax (matches torch.argmax) ---
        idx = lax.broadcasted_iota(jnp.int32, (B, Vt), 1)
        mx = jnp.max(logits, axis=-1, keepdims=True)
        top_idx = jnp.min(jnp.where(logits == mx, idx, Vt),
                          axis=-1, keepdims=True)                # (B, 1) i32
        pred_ref[0] = top_idx

        # --- next input: teacher-forced target embedding, else re-embed argmax
        #     (the one-hot + MXU re-embed is skipped on forced steps) ---
        h_scr[...] = h_new
        force = flags_ref[t] > 0

        @pl.when(force)
        def _():
            x_scr[...] = tgt_ref[0]                              # emb(target[:,t])

        @pl.when(jnp.logical_not(force))
        def _():
            top_oh = (idx == top_idx).astype(jnp.float32)        # (B, Vt)
            x_scr[...] = jnp.dot(top_oh, emb_ref[...],
                                 preferred_element_type=jnp.float32)


# ----------------------------------------------------------------------------
# Parameters + lane padding / fusing into the layout the kernels use.
# ----------------------------------------------------------------------------
def make_params(key, *, v_src, v_tgt, emb, hid, attn):
    ks = jax.random.split(key, 10)
    s = 0.1
    return dict(
        enc_emb=jax.random.normal(ks[0], (v_src, emb), jnp.float32) * s,
        enc_wih=jax.random.normal(ks[1], (emb, 3 * hid), jnp.float32) * s,
        enc_whh=jax.random.normal(ks[2], (hid, 3 * hid), jnp.float32) * s,
        enc_bih=jnp.zeros((1, 3 * hid), jnp.float32),
        enc_bhh=jnp.zeros((1, 3 * hid), jnp.float32),
        dec_emb=jax.random.normal(ks[3], (v_tgt, emb), jnp.float32) * s,
        w_attn_h=jax.random.normal(ks[4], (hid, attn), jnp.float32) * s,
        w_attn_e=jax.random.normal(ks[5], (hid, attn), jnp.float32) * s,
        b_attn=jnp.zeros((1, attn), jnp.float32),
        v_attn=jax.random.normal(ks[6], (attn, 1), jnp.float32) * s,
        dec_wih_e=jax.random.normal(ks[7], (emb, 3 * hid), jnp.float32) * s,
        dec_wih_c=jax.random.normal(ks[8], (hid, 3 * hid), jnp.float32) * s,
        dec_whh=jax.random.normal(ks[9], (hid, 3 * hid), jnp.float32) * s,
        dec_bih=jnp.zeros((1, 3 * hid), jnp.float32),
        dec_bhh=jnp.zeros((1, 3 * hid), jnp.float32),
        w_out_h=jax.random.normal(ks[0], (hid, v_tgt), jnp.float32) * s,
        w_out_c=jax.random.normal(ks[1], (hid, v_tgt), jnp.float32) * s,
        w_out_e=jax.random.normal(ks[2], (emb, v_tgt), jnp.float32) * s,
        b_out=jnp.zeros((1, v_tgt), jnp.float32),
    )


def _rup(x, m=128):
    return ((x + m - 1) // m) * m


def pad_params(p):
    """Zero-pad feature dims to 128-lane multiples and fuse the split weight
    matrices (padded units stay identically zero, so the math is exact)."""
    hid = p["enc_whh"].shape[0]
    emb = p["enc_emb"].shape[1]
    attn = p["w_attn_h"].shape[1]
    v_src = p["enc_emb"].shape[0]
    v_tgt = p["dec_emb"].shape[0]
    H, E, A = _rup(hid), _rup(emb), _rup(attn)
    Vs, Vt = _rup(v_src), _rup(v_tgt)

    def pad2(w, r, c):
        return jnp.pad(w, ((0, r - w.shape[0]), (0, c - w.shape[1])))

    def pad_gates(w, rows):   # (in, 3*hid) -> (rows, 3*H), per-gate column pad
        blocks = jnp.split(w, 3, axis=1)
        return jnp.concatenate([pad2(b, rows, H) for b in blocks], axis=1)

    dec_w_ix = jnp.concatenate([pad_gates(p["dec_wih_e"], E),
                                pad_gates(p["dec_wih_c"], H)], axis=0)   # (E+H,3H)
    dec_w_out = jnp.concatenate([pad2(p["w_out_h"], H, Vt),
                                 pad2(p["w_out_c"], H, Vt),
                                 pad2(p["w_out_e"], E, Vt)], axis=0)     # (2H+E,Vt)

    return dict(
        enc_emb=pad2(p["enc_emb"], Vs, E),
        enc_wih=pad_gates(p["enc_wih"], E),
        enc_whh=pad_gates(p["enc_whh"], H),
        enc_bih=pad_gates(p["enc_bih"], 1),
        enc_bhh=pad_gates(p["enc_bhh"], 1),
        dec_emb=pad2(p["dec_emb"], Vt, E),
        w_attn_h=pad2(p["w_attn_h"], H, A),
        w_attn_e=pad2(p["w_attn_e"], H, A),
        b_attn=pad2(p["b_attn"], 1, A),
        v_attn_row=pad2(p["v_attn"].T, 1, A),
        dec_w_ix=dec_w_ix,
        dec_whh=pad_gates(p["dec_whh"], H),
        dec_bih=pad_gates(p["dec_bih"], 1),
        dec_bhh=pad_gates(p["dec_bhh"], 1),
        dec_w_out=dec_w_out,
        # padded vocab columns get a huge negative bias so argmax never picks
        # them (padded logits are sliced off before returning to the caller).
        b_out=jnp.pad(p["b_out"], ((0, 0), (0, Vt - v_tgt)),
                      constant_values=-1e30),
    )


VMEM_SPEC = pl.BlockSpec(memory_space=pltpu.MemorySpace.VMEM)   # whole array, VMEM
SMEM_SPEC = pl.BlockSpec(memory_space=pltpu.MemorySpace.SMEM)   # whole array, SMEM


def _compiler_params():
    """Generation-aware VMEM limit: 3/4 of physical, capped at 100 MiB."""
    cap = 64 * 1024 * 1024
    try:
        info = pltpu.get_tpu_info()
        for name in ("vmem_capacity_bytes", "vmem_size_bytes", "vmem_bytes"):
            v = getattr(info, name, None)
            if v:
                cap = int(v)
                break
    except Exception:
        pass
    limit = min(max(32 * 1024 * 1024, (cap * 3) // 4), 100 * 1024 * 1024)
    return pltpu.CompilerParams(dimension_semantics=("arbitrary",),
                                vmem_limit_bytes=limit)


_CPARAMS = _compiler_params()


@functools.partial(jax.jit, static_argnames=("v_src", "v_tgt"))
def seq2seq_forward(params, sent, target, length, mask, force_flags,
                    *, v_src, v_tgt):
    """Mirrors Seq2Seq.forward(sent, target, power_force_ratio, length, mask).

    params: padded/fused params from pad_params(make_params(...))
    sent:   (B, S) int32 source tokens
    target: (B, T) int32 target tokens
    length: (B,)   int32 source lengths
    mask:   (B, S) float32 source mask (1 = valid)
    force_flags: (T,) int32 — precomputed teacher-forcing draws
    Returns (outputs (B, T, v_tgt) f32, predict (B, T-1) int32).
    """
    del v_src
    B, S = sent.shape
    T = target.shape[1]
    Hp = params["enc_whh"].shape[0]
    Ep = params["enc_emb"].shape[1]
    Ap = params["w_attn_h"].shape[1]
    Vt_p = params["dec_emb"].shape[0]

    # Pad batch to a full sublane (>= 8, multiple of 8); padded rows have
    # length 0 / mask 0 so they never influence real rows and are sliced off.
    Bp = max(8, -(-B // 8) * 8)
    pb = Bp - B
    sent_p = jnp.pad(sent, ((0, pb), (0, 0)))
    target_p = jnp.pad(target, ((0, pb), (0, 0)))
    length_p = jnp.pad(length, (0, pb)).astype(jnp.int32)
    mask_p = jnp.pad(mask, ((0, pb), (0, 0)))

    # Pre-embedded source/target tokens (wrapper-side gathers; no one-hot in VMEM).
    src_emb = jnp.take(params["enc_emb"], sent_p.T, axis=0)        # (S, Bp, Ep)
    tgt_emb = jnp.take(params["dec_emb"], target_p.T, axis=0)      # (T, Bp, Ep)
    enc_valid = (jnp.arange(S)[:, None] < length_p[None, :]
                 ).astype(jnp.float32).reshape(S, Bp, 1)           # (S, Bp, 1)
    mask_t = mask_p.T.reshape(S, Bp, 1).astype(jnp.float32)        # (S, Bp, 1)

    # ---------------- encoder: grid over source time ----------------
    enc_out, h_enc = pl.pallas_call(
        encoder_kernel,
        grid=(S,),
        out_shape=(jax.ShapeDtypeStruct((S, Bp, Hp), jnp.float32),
                   jax.ShapeDtypeStruct((Bp, Hp), jnp.float32)),
        in_specs=[
            pl.BlockSpec((1, Bp, Ep), lambda s: (s, 0, 0)),        # src emb (stream)
            pl.BlockSpec((1, Bp, 1), lambda s: (s, 0, 0)),         # validity (stream)
            VMEM_SPEC, VMEM_SPEC, VMEM_SPEC, VMEM_SPEC,            # GRU weights
        ],
        out_specs=(pl.BlockSpec((1, Bp, Hp), lambda s: (s, 0, 0)), # enc states
                   pl.BlockSpec((Bp, Hp), lambda s: (0, 0))),      # final hidden
        compiler_params=_CPARAMS,
    )(src_emb, enc_valid, params["enc_wih"], params["enc_whh"],
      params["enc_bih"], params["enc_bhh"])

    # ---------------- decoder: grid over target time ----------------
    outs_tbv, pred_tb1 = pl.pallas_call(
        decoder_kernel,
        grid=(T,),
        out_shape=(jax.ShapeDtypeStruct((T, Bp, Vt_p), jnp.float32),
                   jax.ShapeDtypeStruct((T, Bp, 1), jnp.int32)),
        in_specs=[
            VMEM_SPEC,                                             # enc_out
            VMEM_SPEC,                                             # mask
            pl.BlockSpec((1, Bp, Ep), lambda t: (t, 0, 0)),        # tgt emb (stream)
            VMEM_SPEC,                                             # h0
            SMEM_SPEC,                                             # force flags
            VMEM_SPEC,                                             # dec_emb
            VMEM_SPEC, VMEM_SPEC, VMEM_SPEC, VMEM_SPEC,            # wah, wae, b, v
            VMEM_SPEC, VMEM_SPEC, VMEM_SPEC, VMEM_SPEC,            # wix, whh, bih, bhh
            VMEM_SPEC, VMEM_SPEC,                                  # wout, bout
        ],
        out_specs=(pl.BlockSpec((1, Bp, Vt_p), lambda t: (t, 0, 0)),
                   pl.BlockSpec((1, Bp, 1), lambda t: (t, 0, 0))),
        scratch_shapes=[pltpu.VMEM((Bp, Hp), jnp.float32),         # hidden carry
                        pltpu.VMEM((Bp, Ep), jnp.float32),         # input carry
                        pltpu.VMEM((S, Bp, Ap), jnp.float32)],     # enc projection
        compiler_params=_CPARAMS,
    )(enc_out, mask_t, tgt_emb, h_enc, force_flags.astype(jnp.int32),
      params["dec_emb"], params["w_attn_h"], params["w_attn_e"],
      params["b_attn"], params["v_attn_row"], params["dec_w_ix"],
      params["dec_whh"], params["dec_bih"], params["dec_bhh"],
      params["dec_w_out"], params["b_out"])

    outputs = jnp.transpose(outs_tbv, (1, 0, 2))[:B, :, :v_tgt]    # (B, T, Vtgt)
    predict = pred_tb1[1:, :B, 0].T                                # (B, T-1)
    return outputs, predict


if __name__ == "__main__":
    B, S, T = 2, 8, 8
    V_SRC, V_TGT, EMB, HID, ATT = 24, 24, 16, 32, 16
    POWER_FORCE_RATIO = 0.5

    root = jax.random.PRNGKey(0)
    k_par, k_sent, k_tgt, k_force = jax.random.split(root, 4)

    params = pad_params(make_params(k_par, v_src=V_SRC, v_tgt=V_TGT,
                                    emb=EMB, hid=HID, attn=ATT))

    sent = jax.random.randint(k_sent, (B, S), 0, V_SRC, dtype=jnp.int32)
    target = jax.random.randint(k_tgt, (B, T), 0, V_TGT, dtype=jnp.int32)
    length = jnp.array([S, 5], dtype=jnp.int32)
    mask = (jnp.arange(S)[None, :] < length[:, None]).astype(jnp.float32)
    # TODO(synk): torch uses Python random.random() per step for teacher forcing;
    # replicated deterministically with jax.random draws precomputed per step.
    force_flags = (jax.random.uniform(k_force, (T,))
                   <= POWER_FORCE_RATIO).astype(jnp.int32)

    outputs, predict = seq2seq_forward(params, sent, target, length, mask,
                                       force_flags, v_src=V_SRC, v_tgt=V_TGT)
    jax.block_until_ready((outputs, predict))

    assert outputs.shape == (B, T, V_TGT) and outputs.dtype == jnp.float32
    assert predict.shape == (B, T - 1)
    assert bool(jnp.all(outputs[:, 0, :] == 0.0))
    assert bool(jnp.all(jnp.isfinite(outputs[:, 1:, :])))
    # in-kernel argmax must agree with a wrapper-side argmax over the logits
    assert bool(jnp.all(predict == jnp.argmax(outputs[:, 1:, :], axis=-1)))
    print("KERNEL_OK")
</pallas_src>

<mosaic_0001>
module attributes {stable_mosaic.version = 11 : i64} {
  func.func @decoder_kernel(%arg0: i32, %arg1: memref<8x8x128xf32, #tpu.memory_space<vmem>>, %arg2: memref<8x8x1xf32, #tpu.memory_space<vmem>>, %arg3: memref<1x8x128xf32, #tpu.memory_space<vmem>>, %arg4: memref<8x128xf32, #tpu.memory_space<vmem>>, %arg5: memref<8xi32, #tpu.memory_space<smem>>, %arg6: memref<128x128xf32, #tpu.memory_space<vmem>>, %arg7: memref<128x128xf32, #tpu.memory_space<vmem>>, %arg8: memref<128x128xf32, #tpu.memory_space<vmem>>, %arg9: memref<1x128xf32, #tpu.memory_space<vmem>>, %arg10: memref<1x128xf32, #tpu.memory_space<vmem>>, %arg11: memref<256x384xf32, #tpu.memory_space<vmem>>, %arg12: memref<128x384xf32, #tpu.memory_space<vmem>>, %arg13: memref<1x384xf32, #tpu.memory_space<vmem>>, %arg14: memref<1x384xf32, #tpu.memory_space<vmem>>, %arg15: memref<384x128xf32, #tpu.memory_space<vmem>>, %arg16: memref<1x128xf32, #tpu.memory_space<vmem>>, %arg17: memref<1x8x128xf32, #tpu.memory_space<vmem>>, %arg18: memref<1x8x1xi32, #tpu.memory_space<vmem>>, %arg19: memref<8x128xf32, #tpu.memory_space<vmem>>, %arg20: memref<8x128xf32, #tpu.memory_space<vmem>>, %arg21: memref<8x8x128xf32, #tpu.memory_space<vmem>>) attributes {dimension_semantics = [#tpu.dimension_semantics<arbitrary>], iteration_bounds = array<i64: 8>, scalar_prefetch = 0 : i64, scratch_operands = 3 : i64, tpu.core_type = #tpu.core_type<tc>, window_params = [{pipeline_mode = #tpu.pipeline_mode<synchronous>, transform_indices = @transform_0, window_bounds = array<i64: 8, 8, 128>}, {pipeline_mode = #tpu.pipeline_mode<synchronous>, transform_indices = @transform_1, window_bounds = array<i64: 8, 8, 1>}, {transform_indices = @transform_2, window_bounds = array<i64: 1, 8, 128>}, {pipeline_mode = #tpu.pipeline_mode<synchronous>, transform_indices = @transform_3, window_bounds = array<i64: 8, 128>}, {transform_indices = @transform_4, window_bounds = array<i64: 8>}, {pipeline_mode = #tpu.pipeline_mode<synchronous>, transform_indices = @transform_5, window_bounds = array<i64: 128, 128>}, {pipeline_mode = #tpu.pipeline_mode<synchronous>, transform_indices = @transform_6, window_bounds = array<i64: 128, 128>}, {pipeline_mode = #tpu.pipeline_mode<synchronous>, transform_indices = @transform_7, window_bounds = array<i64: 128, 128>}, {pipeline_mode = #tpu.pipeline_mode<synchronous>, transform_indices = @transform_8, window_bounds = array<i64: 1, 128>}, {pipeline_mode = #tpu.pipeline_mode<synchronous>, transform_indices = @transform_9, window_bounds = array<i64: 1, 128>}, {pipeline_mode = #tpu.pipeline_mode<synchronous>, transform_indices = @transform_10, window_bounds = array<i64: 256, 384>}, {pipeline_mode = #tpu.pipeline_mode<synchronous>, transform_indices = @transform_11, window_bounds = array<i64: 128, 384>}, {pipeline_mode = #tpu.pipeline_mode<synchronous>, transform_indices = @transform_12, window_bounds = array<i64: 1, 384>}, {pipeline_mode = #tpu.pipeline_mode<synchronous>, transform_indices = @transform_13, window_bounds = array<i64: 1, 384>}, {pipeline_mode = #tpu.pipeline_mode<synchronous>, transform_indices = @transform_14, window_bounds = array<i64: 384, 128>}, {pipeline_mode = #tpu.pipeline_mode<synchronous>, transform_indices = @transform_15, window_bounds = array<i64: 1, 128>}, {transform_indices = @transform_16, window_bounds = array<i64: 1, 8, 128>}, {transform_indices = @transform_17, window_bounds = array<i64: 1, 8, 1>}]} {
    %c0_i32 = arith.constant 0 : i32
    %0 = arith.cmpi eq, %arg0, %c0_i32 : i32
    %1 = arith.extui %0 : i1 to i32
    %c0_i32_0 = arith.constant 0 : i32
    %2 = arith.cmpi ne, %1, %c0_i32_0 : i32
    scf.if %2 {
      %c0 = arith.constant 0 : index
      %c0_3 = arith.constant 0 : index
      %6 = vector.load %arg4[%c0, %c0_3] : memref<8x128xf32, #tpu.memory_space<vmem>>, vector<8x128xf32>
      %c0_4 = arith.constant 0 : index
      %c0_5 = arith.constant 0 : index
      %7 = vector.load %arg19[%c0_4, %c0_5] : memref<8x128xf32, #tpu.memory_space<vmem>>, vector<8x128xf32>
      tpu.vector_store %arg19[%c0_4, %c0_5], %6 {strides = array<i32>} : memref<8x128xf32, #tpu.memory_space<vmem>>, vector<8x128xf32>,
      %c0_6 = arith.constant 0 : index
      %c0_7 = arith.constant 0 : index
      %c0_8 = arith.constant 0 : index
      %8 = vector.load %arg3[%c0_6, %c0_7, %c0_8] : memref<1x8x128xf32, #tpu.memory_space<vmem>>, vector<1x8x128xf32>
      %9 = vector.shape_cast %8 : vector<1x8x128xf32> to vector<8x128xf32>
      %c0_9 = arith.constant 0 : index
      %c0_10 = arith.constant 0 : index
      %10 = vector.load %arg20[%c0_9, %c0_10] : memref<8x128xf32, #tpu.memory_space<vmem>>, vector<8x128xf32>
      tpu.vector_store %arg20[%c0_9, %c0_10], %9 {strides = array<i32>} : memref<8x128xf32, #tpu.memory_space<vmem>>, vector<8x128xf32>,
      %c0_11 = arith.constant 0 : index
      %c0_12 = arith.constant 0 : index
      %c0_13 = arith.constant 0 : index
      %11 = vector.load %arg1[%c0_11, %c0_12, %c0_13] : memref<8x8x128xf32, #tpu.memory_space<vmem>>, vector<8x8x128xf32>
      %12 = vector.shape_cast %11 : vector<8x8x128xf32> to vector<64x128xf32>
      %c0_14 = arith.constant 0 : index
      %c0_15 = arith.constant 0 : index
      %13 = vector.load %arg8[%c0_14, %c0_15] : memref<128x128xf32, #tpu.memory_space<vmem>>, vector<128x128xf32>
      %cst = arith.constant dense<0.000000e+00> : vector<64x128xf32>
      %14 = tpu.matmul %12, %13, %cst {dimension_numbers = #tpu.dot_dimension_numbers<[1], [0], [0], [1], [0, 0, 1, 1], [], []>} : vector<64x128xf32>, vector<128x128xf32>, vector<64x128xf32> -> vector<64x128xf32>
      %c0_16 = arith.constant 0 : index
      %c0_17 = arith.constant 0 : index
      %15 = vector.load %arg9[%c0_16, %c0_17] : memref<1x128xf32, #tpu.memory_space<vmem>>, vector<1x128xf32>
      %16 = vector.broadcast %15 : vector<1x128xf32> to vector<64x128xf32>
      %17 = arith.addf %14, %16 : vector<64x128xf32>
      %18 = vector.shape_cast %17 : vector<64x128xf32> to vector<8x8x128xf32>
      %c0_18 = arith.constant 0 : index
      %c0_19 = arith.constant 0 : index
      %c0_20 = arith.constant 0 : index
      %19 = vector.load %arg21[%c0_18, %c0_19, %c0_20] : memref<8x8x128xf32, #tpu.memory_space<vmem>>, vector<8x8x128xf32>
      tpu.vector_store %arg21[%c0_18, %c0_19, %c0_20], %18 {strides = array<i32>} : memref<8x8x128xf32, #tpu.memory_space<vmem>>, vector<8x8x128xf32>,
      %cst_21 = arith.constant 0.000000e+00 : f32
      %20 = vector.broadcast %cst_21 : f32 to vector<8x128xf32>
      %c0_22 = arith.constant 0 : index
      %c0_23 = arith.constant 0 : index
      %c0_24 = arith.constant 0 : index
      %21 = vector.load %arg17[%c0_22, %c0_23, %c0_24] : memref<1x8x128xf32, #tpu.memory_space<vmem>>, vector<1x8x128xf32>
      %22 = vector.shape_cast %21 : vector<1x8x128xf32> to vector<8x128xf32>
      %23 = vector.shape_cast %20 : vector<8x128xf32> to vector<1x8x128xf32>
      tpu.vector_store %arg17[%c0_22, %c0_23, %c0_24], %23 {strides = array<i32>} : memref<1x8x128xf32, #tpu.memory_space<vmem>>, vector<1x8x128xf32>,
      %c0_i32_25 = arith.constant 0 : i32
      %24 = vector.broadcast %c0_i32_25 : i32 to vector<8x1xi32>
      %c0_26 = arith.constant 0 : index
      %c0_27 = arith.constant 0 : index
      %c0_28 = arith.constant 0 : index
      %25 = vector.load %arg18[%c0_26, %c0_27, %c0_28] : memref<1x8x1xi32, #tpu.memory_space<vmem>>, vector<1x8x1xi32>
      %26 = vector.shape_cast %25 : vector<1x8x1xi32> to vector<8x1xi32>
      %27 = vector.shape_cast %24 : vector<8x1xi32> to vector<1x8x1xi32>
      tpu.vector_store %arg18[%c0_26, %c0_27, %c0_28], %27 {strides = array<i32>} : memref<1x8x1xi32, #tpu.memory_space<vmem>>, vector<1x8x1xi32>,
    } else {
    }
    %c0_i32_1 = arith.constant 0 : i32
    %3 = arith.cmpi sgt, %arg0, %c0_i32_1 : i32
    %4 = arith.extui %3 : i1 to i32
    %c0_i32_2 = arith.constant 0 : i32
    %5 = arith.cmpi ne, %4, %c0_i32_2 : i32
    scf.if %5 {
      %c0 = arith.constant 0 : index
      %c0_3 = arith.constant 0 : index
      %6 = vector.load %arg19[%c0, %c0_3] : memref<8x128xf32, #tpu.memory_space<vmem>>, vector<8x128xf32>
      %c0_4 = arith.constant 0 : index
      %c0_5 = arith.constant 0 : index
      %7 = vector.load %arg20[%c0_4, %c0_5] : memref<8x128xf32, #tpu.memory_space<vmem>>, vector<8x128xf32>
      %c0_6 = arith.constant 0 : index
      %c0_7 = arith.constant 0 : index
      %8 = vector.load %arg7[%c0_6, %c0_7] : memref<128x128xf32, #tpu.memory_space<vmem>>, vector<128x128xf32>
      %cst = arith.constant dense<0.000000e+00> : vector<8x128xf32>
      %9 = tpu.matmul %6, %8, %cst {dimension_numbers = #tpu.dot_dimension_numbers<[1], [0], [0], [1], [0, 0, 1, 1], [], []>} : vector<8x128xf32>, vector<128x128xf32>, vector<8x128xf32> -> vector<8x128xf32>
      %c0_8 = arith.constant 0 : index
      %c0_9 = arith.constant 0 : index
      %c0_10 = arith.constant 0 : index
      %10 = vector.load %arg21[%c0_8, %c0_9, %c0_10] : memref<8x8x128xf32, #tpu.memory_space<vmem>>, vector<8x8x128xf32>
      %11 = vector.shape_cast %9 : vector<8x128xf32> to vector<1x8x128xf32>
      %12 = vector.broadcast %11 : vector<1x8x128xf32> to vector<8x8x128xf32>
      %13 = arith.addf %10, %12 : vector<8x8x128xf32>
      %14 = math.tanh %13 : vector<8x8x128xf32>
      %c0_11 = arith.constant 0 : index
      %c0_12 = arith.constant 0 : index
      %15 = vector.load %arg10[%c0_11, %c0_12] : memref<1x128xf32, #tpu.memory_space<vmem>>, vector<1x128xf32>
      %16 = vector.shape_cast %15 : vector<1x128xf32> to vector<1x1x128xf32>
      %17 = vector.broadcast %16 : vector<1x1x128xf32> to vector<8x8x128xf32>
      %18 = arith.mulf %14, %17 : vector<8x8x128xf32>
      %cst_13 = arith.constant dense<0.000000e+00> : vector<8x8xf32>
      %19 = vector.multi_reduction <add>, %18, %cst_13 [2] : vector<8x8x128xf32> to vector<8x8xf32>
      %20 = vector.shape_cast %19 : vector<8x8xf32> to vector<8x8x1xf32>
      %c0_14 = arith.constant 0 : index
      %c0_15 = arith.constant 0 : index
      %c0_16 = arith.constant 0 : index
      %21 = vector.load %arg2[%c0_14, %c0_15, %c0_16] : memref<8x8x1xf32, #tpu.memory_space<vmem>>, vector<8x8x1xf32>
      %cst_17 = arith.constant 0.000000e+00 : f32
      %22 = vector.broadcast %cst_17 : f32 to vector<8x8x1xf32>
      %23 = arith.cmpf ogt, %21, %22 : vector<8x8x1xf32>
      %cst_18 = arith.constant -1.000000e+09 : f32
      %24 = vector.broadcast %cst_18 : f32 to vector<8x8x1xf32>
      %25 = arith.select %23, %20, %24 : vector<8x8x1xi1>, vector<8x8x1xf32>
      %cst_19 = arith.constant dense<0xFF800000> : vector<8x1xf32>
      %26 = vector.multi_reduction <maximumf>, %25, %cst_19 [0] : vector<8x8x1xf32> to vector<8x1xf32>
      %27 = vector.shape_cast %26 : vector<8x1xf32> to vector<1x8x1xf32>
      %28 = vector.broadcast %27 : vector<1x8x1xf32> to vector<8x8x1xf32>
      %29 = arith.subf %25, %28 : vector<8x8x1xf32>
      %30 = math.exp %29 : vector<8x8x1xf32>
      %cst_20 = arith.constant dense<0.000000e+00> : vector<8x1xf32>
      %31 = vector.multi_reduction <add>, %30, %cst_20 [0] : vector<8x8x1xf32> to vector<8x1xf32>
      %32 = vector.shape_cast %31 : vector<8x1xf32> to vector<1x8x1xf32>
      %33 = tpu.reciprocal %32 {approx = true} : vector<1x8x1xf32> -> vector<1x8x1xf32>
      %34 = vector.broadcast %33 : vector<1x8x1xf32> to vector<8x8x1xf32>
      %35 = arith.mulf %30, %34 : vector<8x8x1xf32>
      %c0_21 = arith.constant 0 : index
      %c0_22 = arith.constant 0 : index
      %c0_23 = arith.constant 0 : index
      %36 = vector.load %arg1[%c0_21, %c0_22, %c0_23] : memref<8x8x128xf32, #tpu.memory_space<vmem>>, vector<8x8x128xf32>
      %37 = vector.broadcast %35 : vector<8x8x1xf32> to vector<8x8x128xf32>
      %38 = arith.mulf %37, %36 : vector<8x8x128xf32>
      %cst_24 = arith.constant dense<0.000000e+00> : vector<8x128xf32>
      %39 = vector.multi_reduction <add>, %38, %cst_24 [0] : vector<8x8x128xf32> to vector<8x128xf32>
      %40 = tpu.concatenate %7, %39 in 1 : vector<8x128xf32>, vector<8x128xf32> -> vector<8x256xf32>
      %c0_25 = arith.constant 0 : index
      %c0_26 = arith.constant 0 : index
      %41 = vector.load %arg11[%c0_25, %c0_26] : memref<256x384xf32, #tpu.memory_space<vmem>>, vector<256x384xf32>
      %cst_27 = arith.constant dense<0.000000e+00> : vector<8x384xf32>
      %42 = tpu.matmul %40, %41, %cst_27 {dimension_numbers = #tpu.dot_dimension_numbers<[1], [0], [0], [1], [0, 0, 1, 1], [], []>} : vector<8x256xf32>, vector<256x384xf32>, vector<8x384xf32> -> vector<8x384xf32>
      %c0_28 = arith.constant 0 : index
      %c0_29 = arith.constant 0 : index
      %43 = vector.load %arg13[%c0_28, %c0_29] : memref<1x384xf32, #tpu.memory_space<vmem>>, vector<1x384xf32>
      %44 = vector.broadcast %43 : vector<1x384xf32> to vector<8x384xf32>
      %45 = arith.addf %42, %44 : vector<8x384xf32>
      %c0_30 = arith.constant 0 : index
      %c0_31 = arith.constant 0 : index
      %46 = vector.load %arg12[%c0_30, %c0_31] : memref<128x384xf32, #tpu.memory_space<vmem>>, vector<128x384xf32>
      %cst_32 = arith.constant dense<0.000000e+00> : vector<8x384xf32>
      %47 = tpu.matmul %6, %46, %cst_32 {dimension_numbers = #tpu.dot_dimension_numbers<[1], [0], [0], [1], [0, 0, 1, 1], [], []>} : vector<8x128xf32>, vector<128x384xf32>, vector<8x384xf32> -> vector<8x384xf32>
      %c0_33 = arith.constant 0 : index
      %c0_34 = arith.constant 0 : index
      %48 = vector.load %arg14[%c0_33, %c0_34] : memref<1x384xf32, #tpu.memory_space<vmem>>, vector<1x384xf32>
      %49 = vector.broadcast %48 : vector<1x384xf32> to vector<8x384xf32>
      %50 = arith.addf %47, %49 : vector<8x384xf32>
      %51 = vector.extract_strided_slice %45 {offsets = [0, 0], sizes = [8, 128], strides = [1, 1]} : vector<8x384xf32> to vector<8x128xf32>
      %52 = vector.extract_strided_slice %50 {offsets = [0, 0], sizes = [8, 128], strides = [1, 1]} : vector<8x384xf32> to vector<8x128xf32>
      %53 = arith.addf %51, %52 : vector<8x128xf32>
      %54 = arith.negf %53 : vector<8x128xf32>
      %55 = math.exp %54 : vector<8x128xf32>
      %cst_35 = arith.constant 1.000000e+00 : f32
      %56 = vector.broadcast %cst_35 : f32 to vector<8x128xf32>
      %57 = arith.addf %56, %55 : vector<8x128xf32>
      %58 = arith.divf %56, %57 : vector<8x128xf32>
      %59 = vector.extract_strided_slice %45 {offsets = [0, 128], sizes = [8, 128], strides = [1, 1]} : vector<8x384xf32> to vector<8x128xf32>
      %60 = vector.extract_strided_slice %50 {offsets = [0, 128], sizes = [8, 128], strides = [1, 1]} : vector<8x384xf32> to vector<8x128xf32>
      %61 = arith.addf %59, %60 : vector<8x128xf32>
      %62 = arith.negf %61 : vector<8x128xf32>
      %63 = math.exp %62 : vector<8x128xf32>
      %cst_36 = arith.constant 1.000000e+00 : f32
      %64 = vector.broadcast %cst_36 : f32 to vector<8x128xf32>
      %65 = arith.addf %64, %63 : vector<8x128xf32>
      %66 = arith.divf %64, %65 : vector<8x128xf32>
      %67 = vector.extract_strided_slice %45 {offsets = [0, 256], sizes = [8, 128], strides = [1, 1]} : vector<8x384xf32> to vector<8x128xf32>
      %68 = vector.extract_strided_slice %50 {offsets = [0, 256], sizes = [8, 128], strides = [1, 1]} : vector<8x384xf32> to vector<8x128xf32>
      %69 = arith.mulf %58, %68 : vector<8x128xf32>
      %70 = arith.addf %67, %69 : vector<8x128xf32>
      %71 = math.tanh %70 : vector<8x128xf32>
      %cst_37 = arith.constant 1.000000e+00 : f32
      %72 = vector.broadcast %cst_37 : f32 to vector<8x128xf32>
      %73 = arith.subf %72, %66 : vector<8x128xf32>
      %74 = arith.mulf %73, %71 : vector<8x128xf32>
      %75 = arith.mulf %66, %6 : vector<8x128xf32>
      %76 = arith.addf %74, %75 : vector<8x128xf32>
      %77 = tpu.concatenate %76, %39, %7 in 1 : vector<8x128xf32>, vector<8x128xf32>, vector<8x128xf32> -> vector<8x384xf32>
      %c0_38 = arith.constant 0 : index
      %c0_39 = arith.constant 0 : index
      %78 = vector.load %arg15[%c0_38, %c0_39] : memref<384x128xf32, #tpu.memory_space<vmem>>, vector<384x128xf32>
      %cst_40 = arith.constant dense<0.000000e+00> : vector<8x128xf32>
      %79 = tpu.matmul %77, %78, %cst_40 {dimension_numbers = #tpu.dot_dimension_numbers<[1], [0], [0], [1], [0, 0, 1, 1], [], []>} : vector<8x384xf32>, vector<384x128xf32>, vector<8x128xf32> -> vector<8x128xf32>
      %c0_41 = arith.constant 0 : index
      %c0_42 = arith.constant 0 : index
      %80 = vector.load %arg16[%c0_41, %c0_42] : memref<1x128xf32, #tpu.memory_space<vmem>>, vector<1x128xf32>
      %81 = vector.broadcast %80 : vector<1x128xf32> to vector<8x128xf32>
      %82 = arith.addf %79, %81 : vector<8x128xf32>
      %c0_43 = arith.constant 0 : index
      %c0_44 = arith.constant 0 : index
      %c0_45 = arith.constant 0 : index
      %83 = vector.load %arg17[%c0_43, %c0_44, %c0_45] : memref<1x8x128xf32, #tpu.memory_space<vmem>>, vector<1x8x128xf32>
      %84 = vector.shape_cast %83 : vector<1x8x128xf32> to vector<8x128xf32>
      %85 = vector.shape_cast %82 : vector<8x128xf32> to vector<1x8x128xf32>
      tpu.vector_store %arg17[%c0_43, %c0_44, %c0_45], %85 {strides = array<i32>} : memref<1x8x128xf32, #tpu.memory_space<vmem>>, vector<1x8x128xf32>,
      %86 = tpu.iota {dimensions = array<i32: 1>} : vector<8x128xi32>
      %cst_46 = arith.constant dense<0xFF800000> : vector<8xf32>
      %87 = vector.multi_reduction <maximumf>, %82, %cst_46 [1] : vector<8x128xf32> to vector<8xf32>
      %88 = vector.shape_cast %87 : vector<8xf32> to vector<8x1xf32>
      %89 = vector.broadcast %88 : vector<8x1xf32> to vector<8x128xf32>
      %90 = arith.cmpf oeq, %82, %89 : vector<8x128xf32>
      %c128_i32 = arith.constant 128 : i32
      %91 = vector.broadcast %c128_i32 : i32 to vector<8x128xi32>
      %92 = arith.select %90, %86, %91 : vector<8x128xi1>, vector<8x128xi32>
      %cst_47 = arith.constant dense<2147483647> : vector<8xi32>
      %93 = vector.multi_reduction <minsi>, %92, %cst_47 [1] : vector<8x128xi32> to vector<8xi32>
      %94 = vector.shape_cast %93 : vector<8xi32> to vector<8x1xi32>
      %c0_48 = arith.constant 0 : index
      %c0_49 = arith.constant 0 : index
      %c0_50 = arith.constant 0 : index
      %95 = vector.load %arg18[%c0_48, %c0_49, %c0_50] : memref<1x8x1xi32, #tpu.memory_space<vmem>>, vector<1x8x1xi32>
      %96 = vector.shape_cast %95 : vector<1x8x1xi32> to vector<8x1xi32>
      %97 = vector.shape_cast %94 : vector<8x1xi32> to vector<1x8x1xi32>
      tpu.vector_store %arg18[%c0_48, %c0_49, %c0_50], %97 {strides = array<i32>} : memref<1x8x1xi32, #tpu.memory_space<vmem>>, vector<1x8x1xi32>,
      %c0_51 = arith.constant 0 : index
      %c0_52 = arith.constant 0 : index
      %98 = vector.load %arg19[%c0_51, %c0_52] : memref<8x128xf32, #tpu.memory_space<vmem>>, vector<8x128xf32>
      tpu.vector_store %arg19[%c0_51, %c0_52], %76 {strides = array<i32>} : memref<8x128xf32, #tpu.memory_space<vmem>>, vector<8x128xf32>,
      %99 = arith.index_cast %arg0 : i32 to index
      %100 = memref.load %arg5[%99] : memref<8xi32, #tpu.memory_space<smem>>
      %c0_i32_53 = arith.constant 0 : i32
      %101 = arith.cmpi sgt, %100, %c0_i32_53 : i32
      %102 = arith.extui %101 : i1 to i32
      %c0_i32_54 = arith.constant 0 : i32
      %103 = arith.cmpi ne, %102, %c0_i32_54 : i32
      scf.if %103 {
        %c0_56 = arith.constant 0 : index
        %c0_57 = arith.constant 0 : index
        %c0_58 = arith.constant 0 : index
        %107 = vector.load %arg3[%c0_56, %c0_57, %c0_58] : memref<1x8x128xf32, #tpu.memory_space<vmem>>, vector<1x8x128xf32>
        %108 = vector.shape_cast %107 : vector<1x8x128xf32> to vector<8x128xf32>
        %c0_59 = arith.constant 0 : index
        %c0_60 = arith.constant 0 : index
        %109 = vector.load %arg20[%c0_59, %c0_60] : memref<8x128xf32, #tpu.memory_space<vmem>>, vector<8x128xf32>
        tpu.vector_store %arg20[%c0_59, %c0_60], %108 {strides = array<i32>} : memref<8x128xf32, #tpu.memory_space<vmem>>, vector<8x128xf32>,
      } else {
      }
      %true = arith.constant true
      %104 = arith.xori %101, %true : i1
      %105 = arith.extui %104 : i1 to i32
      %c0_i32_55 = arith.constant 0 : i32
      %106 = arith.cmpi ne, %105, %c0_i32_55 : i32
      scf.if %106 {
        %107 = vector.broadcast %94 : vector<8x1xi32> to vector<8x128xi32>
        %108 = arith.cmpi eq, %86, %107 : vector<8x128xi32>
        %109 = arith.extui %108 : vector<8x128xi1> to vector<8x128xi32>
        %110 = arith.sitofp %109 : vector<8x128xi32> to vector<8x128xf32>
        %c0_56 = arith.constant 0 : index
        %c0_57 = arith.constant 0 : index
        %111 = vector.load %arg6[%c0_56, %c0_57] : memref<128x128xf32, #tpu.memory_space<vmem>>, vector<128x128xf32>
        %cst_58 = arith.constant dense<0.000000e+00> : vector<8x128xf32>
        %112 = tpu.matmul %110, %111, %cst_58 {dimension_numbers = #tpu.dot_dimension_numbers<[1], [0], [0], [1], [0, 0, 1, 1], [], []>} : vector<8x128xf32>, vector<128x128xf32>, vector<8x128xf32> -> vector<8x128xf32>
        %c0_59 = arith.constant 0 : index
        %c0_60 = arith.constant 0 : index
        %113 = vector.load %arg20[%c0_59, %c0_60] : memref<8x128xf32, #tpu.memory_space<vmem>>, vector<8x128xf32>
        tpu.vector_store %arg20[%c0_59, %c0_60], %112 {strides = array<i32>} : memref<8x128xf32, #tpu.memory_space<vmem>>, vector<8x128xf32>,
      } else {
      }
    } else {
    }
    return
  }
  func.func @transform_0(%arg0: i32) -> (i32, i32, i32) {
    %c0_i32 = arith.constant 0 : i32
    %c0_i32_0 = arith.constant 0 : i32
    %c0_i32_1 = arith.constant 0 : i32
    %c0_i32_2 = arith.constant 0 : i32
    return %c0_i32, %c0_i32_0, %c0_i32_1 : i32, i32, i32
  }
  func.func @transform_1(%arg0: i32) -> (i32, i32, i32) {
    %c0_i32 = arith.constant 0 : i32
    %c0_i32_0 = arith.constant 0 : i32
    %c0_i32_1 = arith.constant 0 : i32
    %c0_i32_2 = arith.constant 0 : i32
    return %c0_i32, %c0_i32_0, %c0_i32_1 : i32, i32, i32
  }
  func.func @transform_2(%arg0: i32) -> (i32, i32, i32) {
    %c0_i32 = arith.constant 0 : i32
    %c0_i32_0 = arith.constant 0 : i32
    %c0_i32_1 = arith.constant 0 : i32
    return %arg0, %c0_i32, %c0_i32_0 : i32, i32, i32
  }
  func.func @transform_3(%arg0: i32) -> (i32, i32) {
    %c0_i32 = arith.constant 0 : i32
    %c0_i32_0 = arith.constant 0 : i32
    %c0_i32_1 = arith.constant 0 : i32
    return %c0_i32, %c0_i32_0 : i32, i32
  }
  func.func @transform_4(%arg0: i32) -> i32 {
    %c0_i32 = arith.constant 0 : i32
    %c0_i32_0 = arith.constant 0 : i32
    return %c0_i32 : i32
  }
  func.func @transform_5(%arg0: i32) -> (i32, i32) {
    %c0_i32 = arith.constant 0 : i32
    %c0_i32_0 = arith.constant 0 : i32
    %c0_i32_1 = arith.constant 0 : i32
    return %c0_i32, %c0_i32_0 : i32, i32
  }
  func.func @transform_6(%arg0: i32) -> (i32, i32) {
    %c0_i32 = arith.constant 0 : i32
    %c0_i32_0 = arith.constant 0 : i32
    %c0_i32_1 = arith.constant 0 : i32
    return %c0_i32, %c0_i32_0 : i32, i32
  }
  func.func @transform_7(%arg0: i32) -> (i32, i32) {
    %c0_i32 = arith.constant 0 : i32
    %c0_i32_0 = arith.constant 0 : i32
    %c0_i32_1 = arith.constant 0 : i32
    return %c0_i32, %c0_i32_0 : i32, i32
  }
  func.func @transform_8(%arg0: i32) -> (i32, i32) {
    %c0_i32 = arith.constant 0 : i32
    %c0_i32_0 = arith.constant 0 : i32
    %c0_i32_1 = arith.constant 0 : i32
    return %c0_i32, %c0_i32_0 : i32, i32
  }
  func.func @transform_9(%arg0: i32) -> (i32, i32) {
    %c0_i32 = arith.constant 0 : i32
    %c0_i32_0 = arith.constant 0 : i32
    %c0_i32_1 = arith.constant 0 : i32
    return %c0_i32, %c0_i32_0 : i32, i32
  }
  func.func @transform_10(%arg0: i32) -> (i32, i32) {
    %c0_i32 = arith.constant 0 : i32
    %c0_i32_0 = arith.constant 0 : i32
    %c0_i32_1 = arith.constant 0 : i32
    return %c0_i32, %c0_i32_0 : i32, i32
  }
  func.func @transform_11(%arg0: i32) -> (i32, i32) {
    %c0_i32 = arith.constant 0 : i32
    %c0_i32_0 = arith.constant 0 : i32
    %c0_i32_1 = arith.constant 0 : i32
    return %c0_i32, %c0_i32_0 : i32, i32
  }
  func.func @transform_12(%arg0: i32) -> (i32, i32) {
    %c0_i32 = arith.constant 0 : i32
    %c0_i32_0 = arith.constant 0 : i32
    %c0_i32_1 = arith.constant 0 : i32
    return %c0_i32, %c0_i32_0 : i32, i32
  }
  func.func @transform_13(%arg0: i32) -> (i32, i32) {
    %c0_i32 = arith.constant 0 : i32
    %c0_i32_0 = arith.constant 0 : i32
    %c0_i32_1 = arith.constant 0 : i32
    return %c0_i32, %c0_i32_0 : i32, i32
  }
  func.func @transform_14(%arg0: i32) -> (i32, i32) {
    %c0_i32 = arith.constant 0 : i32
    %c0_i32_0 = arith.constant 0 : i32
    %c0_i32_1 = arith.constant 0 : i32
    return %c0_i32, %c0_i32_0 : i32, i32
  }
  func.func @transform_15(%arg0: i32) -> (i32, i32) {
    %c0_i32 = arith.constant 0 : i32
    %c0_i32_0 = arith.constant 0 : i32
    %c0_i32_1 = arith.constant 0 : i32
    return %c0_i32, %c0_i32_0 : i32, i32
  }
  func.func @transform_16(%arg0: i32) -> (i32, i32, i32) {
    %c0_i32 = arith.constant 0 : i32
    %c0_i32_0 = arith.constant 0 : i32
    %c0_i32_1 = arith.constant 0 : i32
    return %arg0, %c0_i32, %c0_i32_0 : i32, i32, i32
  }
  func.func @transform_17(%arg0: i32) -> (i32, i32, i32) {
    %c0_i32 = arith.constant 0 : i32
    %c0_i32_0 = arith.constant 0 : i32
    %c0_i32_1 = arith.constant 0 : i32
    return %arg0, %c0_i32, %c0_i32_0 : i32, i32, i32
  }
}

module attributes {stable_mosaic.version = 11 : i64} {
  func.func @encoder_kernel(%arg0: i32, %arg1: memref<1x8x128xf32, #tpu.memory_space<vmem>>, %arg2: memref<1x8x1xf32, #tpu.memory_space<vmem>>, %arg3: memref<128x384xf32, #tpu.memory_space<vmem>>, %arg4: memref<128x384xf32, #tpu.memory_space<vmem>>, %arg5: memref<1x384xf32, #tpu.memory_space<vmem>>, %arg6: memref<1x384xf32, #tpu.memory_space<vmem>>, %arg7: memref<1x8x128xf32, #tpu.memory_space<vmem>>, %arg8: memref<8x128xf32, #tpu.memory_space<vmem>>) attributes {dimension_semantics = [#tpu.dimension_semantics<arbitrary>], iteration_bounds = array<i64: 8>, scalar_prefetch = 0 : i64, scratch_operands = 0 : i64, tpu.core_type = #tpu.core_type<tc>, window_params = [{transform_indices = @transform_0, window_bounds = array<i64: 1, 8, 128>}, {transform_indices = @transform_1, window_bounds = array<i64: 1, 8, 1>}, {pipeline_mode = #tpu.pipeline_mode<synchronous>, transform_indices = @transform_2, window_bounds = array<i64: 128, 384>}, {pipeline_mode = #tpu.pipeline_mode<synchronous>, transform_indices = @transform_3, window_bounds = array<i64: 128, 384>}, {pipeline_mode = #tpu.pipeline_mode<synchronous>, transform_indices = @transform_4, window_bounds = array<i64: 1, 384>}, {pipeline_mode = #tpu.pipeline_mode<synchronous>, transform_indices = @transform_5, window_bounds = array<i64: 1, 384>}, {transform_indices = @transform_6, window_bounds = array<i64: 1, 8, 128>}, {pipeline_mode = #tpu.pipeline_mode<synchronous>, transform_indices = @transform_7, window_bounds = array<i64: 8, 128>}]} {
    %c0_i32 = arith.constant 0 : i32
    %0 = arith.cmpi eq, %arg0, %c0_i32 : i32
    %1 = arith.extui %0 : i1 to i32
    %c0_i32_0 = arith.constant 0 : i32
    %2 = arith.cmpi ne, %1, %c0_i32_0 : i32
    scf.if %2 {
      %cst_27 = arith.constant 0.000000e+00 : f32
      %57 = vector.broadcast %cst_27 : f32 to vector<8x128xf32>
      %c0_28 = arith.constant 0 : index
      %c0_29 = arith.constant 0 : index
      %58 = vector.load %arg8[%c0_28, %c0_29] : memref<8x128xf32, #tpu.memory_space<vmem>>, vector<8x128xf32>
      tpu.vector_store %arg8[%c0_28, %c0_29], %57 {strides = array<i32>} : memref<8x128xf32, #tpu.memory_space<vmem>>, vector<8x128xf32>,
    } else {
    }
    %c0 = arith.constant 0 : index
    %c0_1 = arith.constant 0 : index
    %3 = vector.load %arg8[%c0, %c0_1] : memref<8x128xf32, #tpu.memory_space<vmem>>, vector<8x128xf32>
    %c0_2 = arith.constant 0 : index
    %c0_3 = arith.constant 0 : index
    %c0_4 = arith.constant 0 : index
    %4 = vector.load %arg1[%c0_2, %c0_3, %c0_4] : memref<1x8x128xf32, #tpu.memory_space<vmem>>, vector<1x8x128xf32>
    %5 = vector.shape_cast %4 : vector<1x8x128xf32> to vector<8x128xf32>
    %c0_5 = arith.constant 0 : index
    %c0_6 = arith.constant 0 : index
    %c0_7 = arith.constant 0 : index
    %6 = vector.load %arg2[%c0_5, %c0_6, %c0_7] : memref<1x8x1xf32, #tpu.memory_space<vmem>>, vector<1x8x1xf32>
    %7 = vector.shape_cast %6 : vector<1x8x1xf32> to vector<8x1xf32>
    %c0_8 = arith.constant 0 : index
    %c0_9 = arith.constant 0 : index
    %8 = vector.load %arg3[%c0_8, %c0_9] : memref<128x384xf32, #tpu.memory_space<vmem>>, vector<128x384xf32>
    %cst = arith.constant dense<0.000000e+00> : vector<8x384xf32>
    %9 = tpu.matmul %5, %8, %cst {dimension_numbers = #tpu.dot_dimension_numbers<[1], [0], [0], [1], [0, 0, 1, 1], [], []>} : vector<8x128xf32>, vector<128x384xf32>, vector<8x384xf32> -> vector<8x384xf32>
    %c0_10 = arith.constant 0 : index
    %c0_11 = arith.constant 0 : index
    %10 = vector.load %arg5[%c0_10, %c0_11] : memref<1x384xf32, #tpu.memory_space<vmem>>, vector<1x384xf32>
    %11 = vector.broadcast %10 : vector<1x384xf32> to vector<8x384xf32>
    %12 = arith.addf %9, %11 : vector<8x384xf32>
    %c0_12 = arith.constant 0 : index
    %c0_13 = arith.constant 0 : index
    %13 = vector.load %arg4[%c0_12, %c0_13] : memref<128x384xf32, #tpu.memory_space<vmem>>, vector<128x384xf32>
    %cst_14 = arith.constant dense<0.000000e+00> : vector<8x384xf32>
    %14 = tpu.matmul %3, %13, %cst_14 {dimension_numbers = #tpu.dot_dimension_numbers<[1], [0], [0], [1], [0, 0, 1, 1], [], []>} : vector<8x128xf32>, vector<128x384xf32>, vector<8x384xf32> -> vector<8x384xf32>
    %c0_15 = arith.constant 0 : index
    %c0_16 = arith.constant 0 : index
    %15 = vector.load %arg6[%c0_15, %c0_16] : memref<1x384xf32, #tpu.memory_space<vmem>>, vector<1x384xf32>
    %16 = vector.broadcast %15 : vector<1x384xf32> to vector<8x384xf32>
    %17 = arith.addf %14, %16 : vector<8x384xf32>
    %18 = vector.extract_strided_slice %12 {offsets = [0, 0], sizes = [8, 128], strides = [1, 1]} : vector<8x384xf32> to vector<8x128xf32>
    %19 = vector.extract_strided_slice %17 {offsets = [0, 0], sizes = [8, 128], strides = [1, 1]} : vector<8x384xf32> to vector<8x128xf32>
    %20 = arith.addf %18, %19 : vector<8x128xf32>
    %21 = arith.negf %20 : vector<8x128xf32>
    %22 = math.exp %21 : vector<8x128xf32>
    %cst_17 = arith.constant 1.000000e+00 : f32
    %23 = vector.broadcast %cst_17 : f32 to vector<8x128xf32>
    %24 = arith.addf %23, %22 : vector<8x128xf32>
    %25 = arith.divf %23, %24 : vector<8x128xf32>
    %26 = vector.extract_strided_slice %12 {offsets = [0, 128], sizes = [8, 128], strides = [1, 1]} : vector<8x384xf32> to vector<8x128xf32>
    %27 = vector.extract_strided_slice %17 {offsets = [0, 128], sizes = [8, 128], strides = [1, 1]} : vector<8x384xf32> to vector<8x128xf32>
    %28 = arith.addf %26, %27 : vector<8x128xf32>
    %29 = arith.negf %28 : vector<8x128xf32>
    %30 = math.exp %29 : vector<8x128xf32>
    %cst_18 = arith.constant 1.000000e+00 : f32
    %31 = vector.broadcast %cst_18 : f32 to vector<8x128xf32>
    %32 = arith.addf %31, %30 : vector<8x128xf32>
    %33 = arith.divf %31, %32 : vector<8x128xf32>
    %34 = vector.extract_strided_slice %12 {offsets = [0, 256], sizes = [8, 128], strides = [1, 1]} : vector<8x384xf32> to vector<8x128xf32>
    %35 = vector.extract_strided_slice %17 {offsets = [0, 256], sizes = [8, 128], strides = [1, 1]} : vector<8x384xf32> to vector<8x128xf32>
    %36 = arith.mulf %25, %35 : vector<8x128xf32>
    %37 = arith.addf %34, %36 : vector<8x128xf32>
    %38 = math.tanh %37 : vector<8x128xf32>
    %cst_19 = arith.constant 1.000000e+00 : f32
    %39 = vector.broadcast %cst_19 : f32 to vector<8x128xf32>
    %40 = arith.subf %39, %33 : vector<8x128xf32>
    %41 = arith.mulf %40, %38 : vector<8x128xf32>
    %42 = arith.mulf %33, %3 : vector<8x128xf32>
    %43 = arith.addf %41, %42 : vector<8x128xf32>
    %cst_20 = arith.constant 0.000000e+00 : f32
    %44 = vector.broadcast %cst_20 : f32 to vector<8x1xf32>
    %45 = arith.cmpf ogt, %7, %44 : vector<8x1xf32>
    %cst_21 = arith.constant 0.000000e+00 : f32
    %46 = vector.shape_cast %45 : vector<8x1xi1> to vector<8x1xi1>
    %47 = vector.broadcast %46 : vector<8x1xi1> to vector<8x128xi1>
    %48 = vector.broadcast %cst_21 : f32 to vector<8x128xf32>
    %49 = arith.select %47, %43, %48 : vector<8x128xi1>, vector<8x128xf32>
    %c0_22 = arith.constant 0 : index
    %c0_23 = arith.constant 0 : index
    %c0_24 = arith.constant 0 : index
    %50 = vector.load %arg7[%c0_22, %c0_23, %c0_24] : memref<1x8x128xf32, #tpu.memory_space<vmem>>, vector<1x8x128xf32>
    %51 = vector.shape_cast %50 : vector<1x8x128xf32> to vector<8x128xf32>
    %52 = vector.shape_cast %49 : vector<8x128xf32> to vector<1x8x128xf32>
    tpu.vector_store %arg7[%c0_22, %c0_23, %c0_24], %52 {strides = array<i32>} : memref<1x8x128xf32, #tpu.memory_space<vmem>>, vector<1x8x128xf32>,
    %53 = vector.shape_cast %45 : vector<8x1xi1> to vector<8x1xi1>
    %54 = vector.broadcast %53 : vector<8x1xi1> to vector<8x128xi1>
    %55 = arith.select %54, %43, %3 : vector<8x128xi1>, vector<8x128xf32>
    %c0_25 = arith.constant 0 : index
    %c0_26 = arith.constant 0 : index
    %56 = vector.load %arg8[%c0_25, %c0_26] : memref<8x128xf32, #tpu.memory_space<vmem>>, vector<8x128xf32>
    tpu.vector_store %arg8[%c0_25, %c0_26], %55 {strides = array<i32>} : memref<8x128xf32, #tpu.memory_space<vmem>>, vector<8x128xf32>,
    return
  }
  func.func @transform_0(%arg0: i32) -> (i32, i32, i32) {
    %c0_i32 = arith.constant 0 : i32
    %c0_i32_0 = arith.constant 0 : i32
    %c0_i32_1 = arith.constant 0 : i32
    return %arg0, %c0_i32, %c0_i32_0 : i32, i32, i32
  }
  func.func @transform_1(%arg0: i32) -> (i32, i32, i32) {
    %c0_i32 = arith.constant 0 : i32
    %c0_i32_0 = arith.constant 0 : i32
    %c0_i32_1 = arith.constant 0 : i32
    return %arg0, %c0_i32, %c0_i32_0 : i32, i32, i32
  }
  func.func @transform_2(%arg0: i32) -> (i32, i32) {
    %c0_i32 = arith.constant 0 : i32
    %c0_i32_0 = arith.constant 0 : i32
    %c0_i32_1 = arith.constant 0 : i32
    return %c0_i32, %c0_i32_0 : i32, i32
  }
  func.func @transform_3(%arg0: i32) -> (i32, i32) {
    %c0_i32 = arith.constant 0 : i32
    %c0_i32_0 = arith.constant 0 : i32
    %c0_i32_1 = arith.constant 0 : i32
    return %c0_i32, %c0_i32_0 : i32, i32
  }
  func.func @transform_4(%arg0: i32) -> (i32, i32) {
    %c0_i32 = arith.constant 0 : i32
    %c0_i32_0 = arith.constant 0 : i32
    %c0_i32_1 = arith.constant 0 : i32
    return %c0_i32, %c0_i32_0 : i32, i32
  }
  func.func @transform_5(%arg0: i32) -> (i32, i32) {
    %c0_i32 = arith.constant 0 : i32
    %c0_i32_0 = arith.constant 0 : i32
    %c0_i32_1 = arith.constant 0 : i32
    return %c0_i32, %c0_i32_0 : i32, i32
  }
  func.func @transform_6(%arg0: i32) -> (i32, i32, i32) {
    %c0_i32 = arith.constant 0 : i32
    %c0_i32_0 = arith.constant 0 : i32
    %c0_i32_1 = arith.constant 0 : i32
    return %arg0, %c0_i32, %c0_i32_0 : i32, i32, i32
  }
  func.func @transform_7(%arg0: i32) -> (i32, i32) {
    %c0_i32 = arith.constant 0 : i32
    %c0_i32_0 = arith.constant 0 : i32
    %c0_i32_1 = arith.constant 0 : i32
    return %c0_i32, %c0_i32_0 : i32, i32
  }
}

</mosaic_0001>

<bundles_post_ra>
// kernel: seq2seq_forward.2
= control target key start
LH: loop header
LB: loop body
LE: loop exit
PB: predicated region body
PF: predicated region fallthrough
CT: control target
= control target key end

     0   :  { %s1123_s24 = smov 0   ;;  %s1490_s0 = inlined_call_operand.vmem [shape: f32[8,8,128], index: 0, kind: input, shape index: {}]   ;;  %s1491_s1 = inlined_call_operand.vmem [shape: f32[8,8,1], index: 1, kind: input, shape index: {}]   ;;  %s1492_s2 = inlined_call_operand.vmem [shape: f32[128,384], index: 2, kind: input, shape index: {}]   ;;  %s1493_s3 = inlined_call_operand.vmem [shape: f32[128,384], index: 3, kind: input, shape index: {}]   ;;  %s1494_s4 = inlined_call_operand.vmem [shape: f32[1,384], index: 4, kind: input, shape index: {}]   ;;  %s1495_s5 = inlined_call_operand.vmem [shape: f32[1,384], index: 5, kind: input, shape index: {}]   ;;  %s1496_s6 = inlined_call_operand.vmem [shape: f32[8,8,128], index: 6, kind: output, shape index: {0}]   ;;  %s1497_s7 = inlined_call_operand.vmem [shape: f32[8,128], index: 7, kind: output, shape index: {1}]  }
   0x1 LB: > { %s811_s25 = sadd.s32 4294967295, %s1076_s24   ;;  %p815_p0 = scmp.ge.s32.totalorder %s1076_s24, 1  ;;  %s1076_s24 = sphi %s1123_s24, %s18_s24  }
   0x2   : > { %p243_p1 = scmp.lt.s32.totalorder %s1076_s24, 9 }
   0x4   : > { %p244_p2 = pnand %p815_p0, %p243_p1 }
   0x5   : > { %p277_p3 = scmp.lt.s32.totalorder (!%p244_p2), %s811_s25, 7  ;;  %p819_p4 = scmp.ne.s32.totalorder (!%p244_p2), %s811_s25, 0 }
   0x6   : > { %247 = sbr.rel (%p244_p2) target bundleno = 349 (0x15d), region = 44 }
   0xd   : > { %s278_s26 = scalar_select %p277_p3, %s811_s25, 7 }
   0xe   : > { %292 = sbr.rel (%p819_p4) target bundleno = 21 (0x15), region = 48  ;;  %v1078_v0 = vmov (!%p819_p4), 0.0  }
   0xf   : > { %s1131_s27 = sshll.u32 %s278_s26, 3  ;;  %293 = vst [vmem:[%s1497_s7] sm:$0xff] (!%p819_p4), %v1078_v0 }
  0x10   : > { %s280_s30 = scalar_lea.vmem %s1490_s0, %s1131_s27  ;;  %s284_s10 = scalar_lea.vmem %s1491_s1, %s1131_s27 }
  0x11   : > { %s288_s13 = scalar_lea.vmem %s1496_s6, %s1131_s27 }
  0x15 PF: > { %v298_v1 = vld [vmem:[%s1492_s2 + $0x8] sm:$0xff]  ;;  %v301_v2 = vld [vmem:[%s1492_s2 + $0x20] sm:$0xff]  ;;  %v300_v5 = vld [vmem:[%s1492_s2 + $0x18] sm:$0xff]  ;;  %v1079_v8 = vmov 0.0|0.0   ;;  %v1080_v9 = vmov 0.0   ;;  %vm1081_vm0 = vmmov 0  }
  0x16   : > { %v297_v3 = vld [vmem:[%s1492_s2] sm:$0xff]  ;;  %v928_v4 = vpack.c.bf16 %v301_v2, %v298_v1  ;;  %v304_v6 = vld [vmem:[%s1492_s2 + $0x38] sm:$0xff]  ;;  %v307_v7 = vld [vmem:[%s1492_s2 + $0x50] sm:$0xff]  ;;  %960 = vmatprep.subr.bf16.mxu1 %v1079_v8  ;;  %426 = vmatprep.mubr.f32.mxu0 %v1080_v9  ;;  %v1082_v15 = vmov 0  }
  0x17   : > { %v930_v10 = vpack.c.bf16 %v300_v5, %v297_v3  ;;  %v932_v11 = vpack.c.bf16 %v307_v7, %v304_v6  ;;  %v303_v12 = vld [vmem:[%s1492_s2 + $0x30] sm:$0xff]  ;;  %v306_v13 = vld [vmem:[%s1492_s2 + $0x48] sm:$0xff]  ;;  %890 = vmatprep.mubr.msk.f32.mxu1 %vm1081_vm0, %v1080_v9  ;;  %1059 = vset.pattern.permute.xlu0 %v1082_v15  ;;  %v313_v16 = vld [vmem:[%s1492_s2 + $0x80] sm:$0xff] }
  0x18   : > { %v310_v14 = vld [vmem:[%s1492_s2 + $0x68] sm:$0xff]  ;;  %929 = vmatprep.subr.bf16.mxu0 %v928_v4  ;;  %v934_v17 = vpack.c.bf16 %v306_v13, %v303_v12  ;;  %v309_v19 = vld [vmem:[%s1492_s2 + $0x60] sm:$0xff]  ;;  %v312_v20 = vld [vmem:[%s1492_s2 + $0x78] sm:$0xff] }
  0x19   : > { %931 = vmatpush1.bf16.msra.mxu0 %v930_v10  ;;  %v936_v18 = vpack.c.bf16 %v313_v16, %v310_v14  ;;  %v316_v21 = vld [vmem:[%s1492_s2 + $0x98] sm:$0xff]  ;;  %v319_v22 = vld [vmem:[%s1492_s2 + $0xb0] sm:$0xff]  ;;  %v938_v23 = vpack.c.bf16 %v312_v20, %v309_v19  ;;  %v318_v26 = vld [vmem:[%s1492_s2 + $0xa8] sm:$0xff] }
  0x1a   : > { %933 = vmatprep.subr.bf16.mxu0 %v932_v11  ;;  %v315_v24 = vld [vmem:[%s1492_s2 + $0x90] sm:$0xff]  ;;  %v940_v25 = vpack.c.bf16 %v319_v22, %v316_v21  ;;  %v302_v28 = vld [vmem:[%s1492_s2 + $0x28] sm:$0xff]  ;;  %v325_v30 = vld [vmem:[%s1492_s2 + $0xe0] sm:$0xff] }
  0x1b   : > { %v299_v27 = vld [vmem:[%s1492_s2 + $0x10] sm:$0xff]  ;;  %v322_v29 = vld [vmem:[%s1492_s2 + $0xc8] sm:$0xff]  ;;  %v305_v32 = vld [vmem:[%s1492_s2 + $0x40] sm:$0xff]  ;;  %v942_v34 = vpack.c.bf16 %v318_v26, %v315_v24 }
  0x1c   : > { %v961_v31 = vpack.c.bf16 %v302_v28, %v299_v27  ;;  %v308_v33 = vld [vmem:[%s1492_s2 + $0x58] sm:$0xff]  ;;  %v944_v36 = vpack.c.bf16 %v325_v30, %v322_v29  ;;  %v321_v37 = vld [vmem:[%s1492_s2 + $0xc0] sm:$0xff]  ;;  %v311_v39 = vld [vmem:[%s1492_s2 + $0x70] sm:$0xff] }
  0x1d   : > { %935 = vmatpush1.bf16.msra.mxu0 %v934_v17  ;;  %v964_v35 = vpack.c.bf16 %v308_v33, %v305_v32  ;;  %v324_v38 = vld [vmem:[%s1492_s2 + $0xd8] sm:$0xff]  ;;  %v331_v41 = vld [vmem:[%s1492_s2 + $0x110] sm:$0xff]  ;;  %v314_v42 = vld [vmem:[%s1492_s2 + $0x88] sm:$0xff] }
  0x1e   : > { %937 = vmatprep.subr.bf16.mxu0 %v936_v18  ;;  %962 = vmatpush3.bf16.msra.mxu1 %v961_v31  ;;  %v328_v40 = vld [vmem:[%s1492_s2 + $0xf8] sm:$0xff]  ;;  %v946_v43 = vpack.c.bf16 %v324_v38, %v321_v37  ;;  %v327_v44 = vld [vmem:[%s1492_s2 + $0xf0] sm:$0xff]  ;;  %v967_v45 = vpack.c.bf16 %v314_v42, %v311_v39  ;;  %v330_v47 = vld [vmem:[%s1492_s2 + $0x108] sm:$0xff] }
  0x1f   : > { %963 = vmatprep.subr.bf16.mxu1 %v1079_v8  ;;  %v948_v46 = vpack.c.bf16 %v331_v41, %v328_v40  ;;  %v317_v48 = vld [vmem:[%s1492_s2 + $0xa0] sm:$0xff]  ;;  %v320_v49 = vld [vmem:[%s1492_s2 + $0xb8] sm:$0xff]  ;;  %v334_v50 = vld [vmem:[%s1492_s2 + $0x128] sm:$0xff]  ;;  %v950_v52 = vpack.c.bf16 %v330_v47, %v327_v44 }
  0x20   : > { %v337_v51 = vld [vmem:[%s1492_s2 + $0x140] sm:$0xff]  ;;  %v970_v54 = vpack.c.bf16 %v320_v49, %v317_v48  ;;  %v336_v56 = vld [vmem:[%s1492_s2 + $0x138] sm:$0xff]  ;;  %v323_v57 = vld [vmem:[%s1492_s2 + $0xd0] sm:$0xff] }
  0x21   : > { %939 = vmatpush1.bf16.msra.mxu0 %v938_v23  ;;  %v333_v53 = vld [vmem:[%s1492_s2 + $0x120] sm:$0xff]  ;;  %v952_v55 = vpack.c.bf16 %v337_v51, %v334_v50  ;;  %v326_v58 = vld [vmem:[%s1492_s2 + $0xe8] sm:$0xff]  ;;  %v340_v59 = vld [vmem:[%s1492_s2 + $0x158] sm:$0xff] }
  0x22   : > { %941 = vmatprep.subr.bf16.mxu0 %v940_v25  ;;  %965 = vmatpush3.bf16.msra.mxu1 %v964_v35  ;;  %v343_v60 = vld [vmem:[%s1492_s2 + $0x170] sm:$0xff]  ;;  %v954_v61 = vpack.c.bf16 %v336_v56, %v333_v53  ;;  %v973_v63 = vpack.c.bf16 %v326_v58, %v323_v57  ;;  %v342_v1 = vld [vmem:[%s1492_s2 + $0x168] sm:$0xff]  ;;  %v329_v2 = vld [vmem:[%s1492_s2 + $0x100] sm:$0xff] }
  0x23   : > { %966 = vmatprep.subr.bf16.mxu1 %v1079_v8  ;;  %v339_v62 = vld [vmem:[%s1492_s2 + $0x150] sm:$0xff]  ;;  %v956_v0 = vpack.c.bf16 %v343_v60, %v340_v59  ;;  %v332_v3 = vld [vmem:[%s1492_s2 + $0x118] sm:$0xff]  ;;  %v504_v4 = vld [vmem:[%s1493_s3 + $0x8] sm:$0xff] }
  0x24   : > { %v507_v5 = vld [vmem:[%s1493_s3 + $0x20] sm:$0xff]  ;;  %v958_v6 = vpack.c.bf16 %v342_v1, %v339_v62  ;;  %v976_v10 = vpack.c.bf16 %v332_v3, %v329_v2  ;;  %v506_v12 = vld [vmem:[%s1493_s3 + $0x18] sm:$0xff]  ;;  %v335_v13 = vld [vmem:[%s1492_s2 + $0x130] sm:$0xff] }
  0x25   : > { %943 = vmatpush1.bf16.msra.mxu0 %v942_v34  ;;  %v503_v7 = vld [vmem:[%s1493_s3] sm:$0xff]  ;;  %v984_v11 = vpack.c.bf16 %v507_v5, %v504_v4  ;;  %v338_v14 = vld [vmem:[%s1492_s2 + $0x148] sm:$0xff]  ;;  %v510_v16 = vld [vmem:[%s1493_s3 + $0x38] sm:$0xff] }
  0x26   : > { %945 = vmatprep.subr.bf16.mxu0 %v944_v36  ;;  %968 = vmatpush3.bf16.msra.mxu1 %v967_v45  ;;  %v513_v17 = vld [vmem:[%s1493_s3 + $0x50] sm:$0xff]  ;;  %v295_v18 = vld [vmem:[%s280_s30] sm:$0xff]  ;;  %v986_v19 = vpack.c.bf16 %v506_v12, %v503_v7  ;;  %v979_v21 = vpack.c.bf16 %v338_v14, %v335_v13  ;;  %v512_v24 = vld [vmem:[%s1493_s3 + $0x48] sm:$0xff] }
  0x27   : > { %969 = vmatprep.subr.bf16.mxu1 %v1079_v8  ;;  %v509_v20 = vld [vmem:[%s1493_s3 + $0x30] sm:$0xff]  ;;  %v296_v22 = vld [vmem:[%s284_s10] sm:$0xff]  ;;  %v988_v23 = vpack.c.bf16 %v513_v17, %v510_v16  ;;  %v344_v26 = vld [vmem:[%s1492_s2 + $0x178] sm:$0xff] }
  0x28   : > { %v341_v25 = vld [vmem:[%s1492_s2 + $0x160] sm:$0xff]  ;;  %vm730_vm1 = vcmp.gt.f32.partialorder %v296_v22, 0.0  ;;  %v516_v27 = vld [vmem:[%s1493_s3 + $0x68] sm:$0xff]  ;;  %v990_v30 = vpack.c.bf16 %v512_v24, %v509_v20  ;;  %v518_v34 = vld [vmem:[%s1493_s3 + $0x78] sm:$0xff] }
  0x29   : > { %947 = vmatpush1.bf16.msra.mxu0 %v946_v43  ;;  %v519_v28 = vld [vmem:[%s1493_s3 + $0x80] sm:$0xff]  ;;  %v731_v29 = vsel %vm730_vm1, 1, %v1082_v15  ;;  %v982_v32 = vpack.c.bf16 %v344_v26, %v341_v25  ;;  %v505_v15 = vld [vmem:[%s1493_s3 + $0x10] sm:$0xff]  ;;  %v508_v35 = vld [vmem:[%s1493_s3 + $0x28] sm:$0xff] }
  0x2a   : > { %949 = vmatprep.subr.bf16.mxu0 %v948_v46  ;;  %971 = vmatpush3.bf16.msra.mxu1 %v970_v54  ;;  %v515_v31 = vld [vmem:[%s1493_s3 + $0x60] sm:$0xff]  ;;  %v992_v33 = vpack.c.bf16 %v519_v28, %v516_v27  ;;  %v522_v36 = vld [vmem:[%s1493_s3 + $0x98] sm:$0xff]  ;;  %v525_v37 = vld [vmem:[%s1493_s3 + $0xb0] sm:$0xff]  ;;  %v1017_v40 = vpack.c.bf16 %v508_v35, %v505_v15 }
  0x2b   : > { %972 = vmatprep.subr.bf16.mxu1 %v1079_v8  ;;  %733 = vperm.xlu0 %1059, %v731_v29   ;;  %v994_v38 = vpack.c.bf16 %v518_v34, %v515_v31  ;;  %v521_v39 = vld [vmem:[%s1493_s3 + $0x90] sm:$0xff]  ;;  %v996_v41 = vpack.c.bf16 %v525_v37, %v522_v36  ;;  %v524_v42 = vld [vmem:[%s1493_s3 + $0xa8] sm:$0xff]  ;;  %v511_v43 = vld [vmem:[%s1493_s3 + $0x40] sm:$0xff] }
  0x2c   : > { %v514_v44 = vld [vmem:[%s1493_s3 + $0x58] sm:$0xff]  ;;  %v528_v45 = vld [vmem:[%s1493_s3 + $0xc8] sm:$0xff]  ;;  %v531_v46 = vld [vmem:[%s1493_s3 + $0xe0] sm:$0xff]  ;;  %v998_v47 = vpack.c.bf16 %v524_v42, %v521_v39 }
  0x2d   : > { %951 = vmatpush1.bf16.msra.mxu0 %v950_v52  ;;  %v527_v48 = vld [vmem:[%s1493_s3 + $0xc0] sm:$0xff]  ;;  %v1020_v49 = vpack.c.bf16 %v514_v44, %v511_v43  ;;  %v1000_v50 = vpack.c.bf16 %v531_v46, %v528_v45  ;;  %v530_v51 = vld [vmem:[%s1493_s3 + $0xd8] sm:$0xff]  ;;  %v517_v52 = vld [vmem:[%s1493_s3 + $0x70] sm:$0xff] }
  0x2e   : > { %953 = vmatprep.subr.bf16.mxu0 %v952_v55  ;;  %974 = vmatpush3.bf16.msra.mxu1 %v973_v63  ;;  %v520_v53 = vld [vmem:[%s1493_s3 + $0x88] sm:$0xff]  ;;  %v534_v54 = vld [vmem:[%s1493_s3 + $0xf8] sm:$0xff]  ;;  %v537_v55 = vld [vmem:[%s1493_s3 + $0x110] sm:$0xff]  ;;  %v1002_v56 = vpack.c.bf16 %v530_v51, %v527_v48 }
  0x2f   : > { %975 = vmatprep.subr.bf16.mxu1 %v1079_v8  ;;  %v533_v57 = vld [vmem:[%s1493_s3 + $0xf0] sm:$0xff]  ;;  %v1023_v58 = vpack.c.bf16 %v520_v53, %v517_v52  ;;  %v1004_v59 = vpack.c.bf16 %v537_v55, %v534_v54  ;;  %v536_v60 = vld [vmem:[%s1493_s3 + $0x108] sm:$0xff]  ;;  %v543_v63 = vld [vmem:[%s1493_s3 + $0x140] sm:$0xff] }
  0x30   : > { %v540_v62 = vld [vmem:[%s1493_s3 + $0x128] sm:$0xff]  ;;  %v539_v1 = vld [vmem:[%s1493_s3 + $0x120] sm:$0xff]  ;;  %v542_v4 = vld [vmem:[%s1493_s3 + $0x138] sm:$0xff] }
  0x31   : > { %955 = vmatpush1.bf16.msra.mxu0 %v954_v61  ;;  %v526_v61 = vld [vmem:[%s1493_s3 + $0xb8] sm:$0xff]  ;;  %v1008_v3 = vpack.c.bf16 %v543_v63, %v540_v62  ;;  %v529_v5 = vld [vmem:[%s1493_s3 + $0xd0] sm:$0xff]  ;;  %v548_v16 = vld [vmem:[%s1493_s3 + $0x168] sm:$0xff] }
  0x32   : > { %957 = vmatprep.subr.bf16.mxu0 %v956_v0  ;;  %977 = vmatpush3.bf16.msra.mxu1 %v976_v10  ;;  %v1006_v0 = vpack.c.bf16 %v536_v60, %v533_v57  ;;  %v546_v7 = vld [vmem:[%s1493_s3 + $0x158] sm:$0xff]  ;;  %v549_v10 = vld [vmem:[%s1493_s3 + $0x170] sm:$0xff]  ;;  %v535_v17 = vld [vmem:[%s1493_s3 + $0x100] sm:$0xff] }
  0x33   : > { %978 = vmatprep.subr.bf16.mxu1 %v1079_v8  ;;  %v545_v12 = vld [vmem:[%s1493_s3 + $0x150] sm:$0xff]  ;;  %v1012_v14 = vpack.c.bf16 %v549_v10, %v546_v7  ;;  %v544_v22 = vld [vmem:[%s1493_s3 + $0x148] sm:$0xff]  ;;  %v547_v25 = vld [vmem:[%s1493_s3 + $0x160] sm:$0xff] }
  0x34   : > { %v550_v26 = vld [vmem:[%s1493_s3 + $0x178] sm:$0xff]  ;;  %v345_v34 = vld [vmem:[%s1494_s4] sm:$0x7] }
  0x35   : > { %959 = vmatpush1.bf16.msra.mxu0 %v958_v6  ;;  %v532_v6 = vld [vmem:[%s1493_s3 + $0xe8] sm:$0xff]  ;;  %v1038_v27 = vpack.c.bf16 %v550_v26, %v547_v25 }
  0x36   : > { %985 = vmatprep.subr.bf16.mxu0 %v984_v11  ;;  %980 = vmatpush3.bf16.msra.mxu1 %v979_v21  ;;  %v1010_v11 = vpack.c.bf16 %v542_v4, %v539_v1  ;;  %v1029_v13 = vpack.c.bf16 %v532_v6, %v529_v5  ;;  %v541_v21 = vld [vmem:[%s1493_s3 + $0x130] sm:$0xff] }
  0x37   : > { %981 = vmatprep.subr.bf16.mxu1 %v1079_v8  ;;  %v1035_v24 = vpack.c.bf16 %v544_v22, %v541_v21 }
  0x38   : > { %427 = vmatmul.mubr.f32.vlgmr.msra.gmra.mrb[0].mxu0 %v295_v18 }
  0x39   : > { %987 = vmatpush1.bf16.msra.mxu0 %v986_v19  ;;  %632 = vmatprep.mubr.f32.mxu0 %v1080_v9  ;;  %v1014_v19 = vpack.c.bf16 %v548_v16, %v545_v12 }
  0x3a   : > { %989 = vmatprep.subr.bf16.mxu0 %v988_v23  ;;  %983 = vmatpush3.bf16.msra.mxu1 %v982_v32  ;;  %v294_v23 = vld [vmem:[%s1497_s7] sm:$0xff] }
  0x3b   : > { %1016 = vmatprep.subr.bf16.mxu1 %v1079_v8 }
  0x3d   : > { %991 = vmatpush1.bf16.msra.mxu0 %v990_v30  ;;  %891 = vmatmul.mubr.f32.vlgmr.msra.gmra.mrb[0].mxu1 %v295_v18  ;;  %v538_v18 = vld [vmem:[%s1493_s3 + $0x118] sm:$0xff]  ;;  %v347_v30 = vlaneseq }
  0x3e   : > { %993 = vmatprep.subr.bf16.mxu0 %v992_v33  ;;  %1018 = vmatpush3.bf16.msra.mxu1 %v1017_v40  ;;  %v1032_v20 = vpack.c.bf16 %v538_v18, %v535_v17  ;;  %v551_v33 = vld [vmem:[%s1495_s5] sm:$0x7] }
  0x3f   : > { %1019 = vmatprep.subr.bf16.mxu1 %v1079_v8  ;;  %925 = vmatprep.mubr.msk.f32.mxu1 %vm1081_vm0, %v1080_v9  ;;  %v523_v9 = vld [vmem:[%s1493_s3 + $0xa0] sm:$0xff]  ;;  %v348_v31 = vshrl.u32 %v347_v30, 7 }
  0x40   : > { %v1026_v2 = vpack.c.bf16 %v526_v61, %v523_v9 }
  0x41   : > { %995 = vmatpush1.bf16.msra.mxu0 %v994_v38  ;;  %v349_v32 = vsub.s32 0, %v348_v31  ;;  %v353_v15 = vsub.s32 1, %v348_v31 }
  0x42   : > { %997 = vmatprep.subr.bf16.mxu0 %v996_v41  ;;  %1021 = vmatpush3.bf16.msra.mxu1 %v1020_v49 }
  0x43   : > { %1022 = vmatprep.subr.bf16.mxu1 %v1079_v8  ;;  %v350_v35 = vrot.slane %v345_v34, %v349_v32  ;;  %v556_v36 = vrot.slane %v551_v33, %v349_v32  ;;  %v354_v37 = vrot.slane %v345_v34, %v353_v15 }
  0x45   : > { %999 = vmatpush1.bf16.msra.mxu0 %v998_v47  ;;  %v1040_v38 = vadd.f32 %v556_v36, %v350_v35 }
  0x46   : > { %1001 = vmatprep.subr.bf16.mxu0 %v1000_v50  ;;  %1024 = vmatpush3.bf16.msra.mxu1 %v1023_v58  ;;  %v357_v50 = vsub.s32 2, %v348_v31 }
  0x47   : > { %1025 = vmatprep.subr.bf16.mxu1 %v1079_v8 }
  0x48   : > { %v564_v51 = vrot.slane %v551_v33, %v357_v50  ;;  %v358_v53 = vrot.slane %v345_v34, %v357_v50 }
  0x49   : > { %1003 = vmatpush1.bf16.msra.mxu0 %v1002_v56 }
  0x4a   : > { %1005 = vmatprep.subr.bf16.mxu0 %v1004_v59  ;;  %1027 = vmatpush3.bf16.msra.mxu1 %v1026_v2 }
  0x4b   : > { %1028 = vmatprep.subr.bf16.mxu1 %v1079_v8 }
  0x4d   : > { %1007 = vmatpush1.bf16.msra.mxu0 %v1006_v0 }
  0x4e   : > { %1009 = vmatprep.subr.bf16.mxu0 %v1008_v3  ;;  %1030 = vmatpush3.bf16.msra.mxu1 %v1029_v13 }
  0x4f   : > { %1031 = vmatprep.subr.bf16.mxu1 %v1079_v8 }
  0x51   : > { %1011 = vmatpush1.bf16.msra.mxu0 %v1010_v11 }
  0x52   : > { %1013 = vmatprep.subr.bf16.mxu0 %v1012_v14  ;;  %1033 = vmatpush3.bf16.msra.mxu1 %v1032_v20 }
  0x53   : > { %1034 = vmatprep.subr.bf16.mxu1 %v1079_v8 }
  0x55   : > { %1015 = vmatpush1.bf16.msra.mxu0 %v1014_v19 }
  0x56   : > { %1036 = vmatpush3.bf16.msra.mxu1 %v1035_v24 }
  0x57   : > { %1037 = vmatprep.subr.bf16.mxu1 %v1079_v8  ;;  %v560_v8 = vrot.slane %v551_v33, %v353_v15 }
  0x58   : > { %633 = vmatmul.mubr.f32.vlgmr.msra.gmra.mrb[0].mxu0 %v294_v23 }
  0x59   : > { %v1042_v40 = vadd.f32 %v560_v8, %v354_v37 }
  0x5a   : > { %1039 = vmatpush3.bf16.msra.mxu1 %v1038_v27 }
  0x5d   : > { %926 = vmatmul.mubr.f32.vlgmr.msra.gmra.mrb[2].mxu1 %v294_v23 }
  0xaa   : > { %v734_v9 = vpop.permute.xlu0 %733 }
  0xab   : > { %vm735_vm2 = vcmp.eq.s32.totalorder %v734_v9, 1 }
 0x110   : > { %v499_v28 = vpop.f32.mrb[0].mxu1 }
 0x111   : > { %v892_v29 = vpop.f32.mrb[1].mxu1  ;;  %v500_v57 = vadd.f32 %v499_v28, %v358_v53 }
 0x12b   : > { %v634_v39 = vpop.f32.mrb[0].mxu0 }
 0x12c   : > { %v1041_v41 = vadd.f32 %v1040_v38, %v634_v39  ;;  %v636_v42 = vpop.f32.mrb[1].mxu0 }
 0x12d   : > { %v1043_v44 = vadd.f32 %v1042_v40, %v636_v42 }
 0x12e   : > { %v820_v43 = vmul.f32 -1.442695, %v1041_v41 }
 0x12f   : > { %v821_v45 = vmul.f32 -1.442695, %v1043_v44 }
 0x130   : > { %1060 = vpow2.f32 %v820_v43  ;;  %v705_v46 = vpop.f32.mrb[2].mxu1 }
 0x131   : > { %v927_v47 = vpop.f32.mrb[3].mxu1  ;;  %1062 = vpow2.f32 %v821_v45  ;;  %v706_v55 = vadd.f32 %v705_v46, %v564_v51 }
 0x13a   : > { %v1061_v48 = vpop.eup %1060 }
 0x13b   : > { %v713_v49 = vadd.f32 1.0, %v1061_v48  ;;  %v1063_v52 = vpop.eup %1062 }
 0x13c   : > { %v720_v54 = vadd.f32 1.0, %v1063_v52 }
 0x13d   : > { %1064 = vrcp.f32 %v713_v49 }
 0x13e   : > { %1066 = vrcp.f32 %v720_v54 }
 0x147   : > { %v1065_v56 = vpop.eup %1064 }
 0x148   : > { %v723_v58 = vmul.f32 %v1065_v56, %v706_v55  ;;  %v1067_v60 = vpop.eup %1066 }
 0x149   : > { %v726_v61 = vsub.f32 1.0, %v1067_v60  ;;  %v728_v0 = vmul.f32 %v1067_v60, %v294_v23 }
 0x14a   : > { %v724_v59 = vadd.f32 %v723_v58, %v500_v57 }
 0x14c   : > { %1068 = vtanh.f32 %v724_v59 }
 0x156   : > { %v1069_v62 = vpop.eup %1068 }
 0x157   : > { %v727_v63 = vmul.f32 %v1069_v62, %v726_v61 }
 0x159   : > { %v729_v1 = vadd.f32 %v728_v0, %v727_v63 }
 0x15b   : > { %v736_v2 = vsel %vm735_vm2, %v729_v1, 0.0  ;;  %v738_v3 = vsel %vm735_vm2, %v729_v1, %v294_v23 }
 0x15c   : > { %737 = vst [vmem:[%s288_s13] sm:$0xff] %v736_v2  ;;  %739 = vst [vmem:[%s1497_s7] sm:$0xff] %v738_v3 }
 0x15d PF: > { %s18_s24 = sadd.s32 1, %s1076_s24  }
 0x15e   : > { %p15_p5 = scmp.ge.s32.totalorder %s18_s24, 10  }
 0x160   :  { %17 = sbr.rel (!%p15_p5) target bundleno = 1 (0x1), region = 89 }

// kernel: seq2seq_forward.3
= control target key start
LH: loop header
LB: loop body
LE: loop exit
PB: predicated region body
PF: predicated region fallthrough
CT: control target
= control target key end

     0   :  { %s3829_s0 = inlined_call_operand.vmem [shape: f32[8,8,128], index: 0, kind: input, shape index: {}]   ;;  %s3830_s1 = inlined_call_operand.vmem [shape: f32[8,8,1], index: 1, kind: input, shape index: {}]   ;;  %s3831_s2 = inlined_call_operand.vmem [shape: f32[8,8,128], index: 2, kind: input, shape index: {}]   ;;  %s3832_s3 = inlined_call_operand.vmem [shape: f32[8,128], index: 3, kind: input, shape index: {}]   ;;  %s3833_s4 = inlined_call_operand.vmem [shape: s32[8], index: 4, kind: input, shape index: {}]   ;;  %s3834_s5 = inlined_call_operand.vmem [shape: f32[128,128], index: 5, kind: input, shape index: {}]   ;;  %s3835_s6 = inlined_call_operand.vmem [shape: f32[128,128], index: 6, kind: input, shape index: {}]   ;;  %s3836_s7 = inlined_call_operand.hbm [shape: f32[128,128], index: 7, kind: input, shape index: {}]   ;;  %s3837_s8 = inlined_call_operand.vmem [shape: f32[1,128], index: 8, kind: input, shape index: {}]   ;;  %s3838_s9 = inlined_call_operand.vmem [shape: f32[1,128], index: 9, kind: input, shape index: {}]   ;;  %s3839_s10 = inlined_call_operand.vmem [shape: f32[256,384], index: 10, kind: input, shape index: {}]   ;;  %s3840_s11 = inlined_call_operand.vmem [shape: f32[128,384], index: 11, kind: input, shape index: {}]   ;;  %s3841_s12 = inlined_call_operand.vmem [shape: f32[1,384], index: 12, kind: input, shape index: {}]   ;;  %s3842_s13 = inlined_call_operand.vmem [shape: f32[1,384], index: 13, kind: input, shape index: {}]   ;;  %s3843_s14 = inlined_call_operand.vmem [shape: f32[384,128], index: 14, kind: input, shape index: {}]   ;;  %s3844_s15 = inlined_call_operand.vmem [shape: f32[1,128], index: 15, kind: input, shape index: {}]   ;;  %s3845_s16 = inlined_call_operand.vmem [shape: f32[8,8,128], index: 16, kind: output, shape index: {0}]   ;;  %s3846_s17 = inlined_call_operand.vmem [shape: s32[8,8,1], index: 17, kind: output, shape index: {1}]  }
   0x1   :  { %3850 = sst [smem:[#allocation11_spill]] %s3829_s0 }
   0x2   :  { %3851 = sst [smem:[#allocation12_spill]] %s3830_s1 }
   0x3   :  { %3852 = sst [smem:[#allocation13_spill]] %s3831_s2 }
   0x4   :  { %3853 = sst [smem:[#allocation14_spill]] %s3832_s3 }
   0x5   :  { %23 = vsyncpa [#allocation7], 0 }
   0x6   :  { %24 = vsyncpa [#allocation6], 0  ;;  %s2877_s24 = smov 0  }
   0x7 LB: > { %s2883_s25 = sadd.s32 4294967295, %s2771_s24   ;;  %p1947_p0 = scmp.ge.s32.totalorder %s2771_s24, 1  ;;  %s2771_s24 = sphi %s2877_s24, %s30_s24  }
   0x8   : > { %p428_p1 = scmp.lt.s32.totalorder %s2771_s24, 9  ;;  %p2641_p3 = scmp.eq.s32.totalorder %s2883_s25, 0 }
   0x9   : > { %s450_s28 = sshll.u32 %s3833_s4, 4  ;;  %s2773_s0 = smov [#allocation8]   ;;  %s451_s28 = int_to_ptr.vmem [resolvable:$true] %s450_s28 }
   0xa   : > { %p2892_p4 = pnand %p1947_p0, %p428_p1  ;;  %s466_s30 = sshll.u32 %s2773_s0, 4  ;;  %s2904_s30 = int_to_ptr.vmem [resolvable:$true] %s466_s30 }
   0xb   : > { %s2714_s19 = scalar_lea.vmem %s451_s28, 16  ;;  %p2722_p11 = scmp.lt.s32.totalorder %s451_s28, %s451_s28 }
   0xc   : > { %p2634_p5 = pneg %p2892_p4  ;;  %p2715_p7 = scmp.ne.s32.totalorder %s451_s28, %s2714_s19 }
   0xd   : > { %p2723_p12 = scmp.lt.s32.totalorder %s2714_s19, %s2714_s19 }
   0xe   : > { %p2900_p6 = pnand %p2641_p3, %p2634_p5 }
   0xf   : > { %p2724_p13 = por %p2723_p12, %p2722_p11 }
  0x10   : > { %p2716_p8 = pneg %p2900_p6 }
  0x12   : > { %p2717_p9 = pnand %p2716_p8, %p2715_p7 }
  0x14   : > { %p2718_p10 = pneg %p2717_p9 }
  0x16   : > { %p2725_p0 = pnand %p2724_p13, %p2718_p10 }
  0x18   : > { %2728 = shalt.err (!%p2725_p0)
}
  0x19   : > { %s2774_s1 = smov [#allocation5]   ;;  %s2729_s22 = scalar_lea.hbm %s3836_s7, 2048 }
  0x1a   : > { %2637 = dma.vmem_to_smem (!%p2900_p6), %s451_s28, 16, %s2774_s1, [#allocation7]  }
  0x1b   : > { %p2730_p1 = scmp.ne.s32.totalorder %s3836_s7, %s2729_s22  ;;  %p2736_p9 = scmp.lt.u32.totalorder %s2729_s22, %s3836_s7 }
  0x1d   : > { %p2732_p5 = pnand %p2730_p1, %p2716_p8 }
  0x1f   : > { %p2733_p7 = pneg %p2732_p5 }
  0x21   : > { %p2738_p10 = pnand %p2736_p9, %p2733_p7 }
  0x23   : > { %2741 = shalt.err (!%p2738_p10)
}
  0x24   : > { %s2742_s28 = scalar_lea.vmem %s2904_s30, 2048  ;;  %p2750_p0 = scmp.lt.s32.totalorder %s2904_s30, %s2904_s30 }
  0x25   : > { %p2743_p11 = scmp.ne.s32.totalorder %s2904_s30, %s2742_s28  ;;  %p2751_p1 = scmp.lt.s32.totalorder %s2742_s28, %s2742_s28 }
  0x27   : > { %p2745_p12 = pnand %p2743_p11, %p2716_p8  ;;  %p2752_p5 = por %p2751_p1, %p2750_p0 }
  0x29   : > { %p2746_p13 = pneg %p2745_p12 }
  0x2b   : > { %p2753_p2 = pnand %p2752_p5, %p2746_p13 }
  0x2d   : > { %2756 = shalt.err (!%p2753_p2)
}
  0x2e   : > { %s2775_s19 = smov 128   ;;  %s2776_s1 = smov 8  }
  0x2f   : > { %2640 = dma.hbm_to_vmem [thread:$0]  (!%p2900_p6), %s3836_s7, 2048, %s2904_s30, [#allocation6], %s2775_s19, %s2775_s19, %s2776_s1  }
  0x30   : > { %513 = sbr.rel (%p2892_p4) target bundleno = 2142 (0x85e), region = 84 }
  0x37   : > { %2762 = dma.done.wait (%p2641_p3), [#allocation7], 16  }
  0x38   : > { %2764 = vsyncadd (%p2641_p3), [#allocation7], 4294967280 }
  0x39   : > { %2766 = dma.done.wait (%p2641_p3), [#allocation6], 2048  }
  0x3a   : > { %2768 = vsyncadd (%p2641_p3), [#allocation6], 4294965248 }
  0x3b   : > { %523 = sfence }
  0x3c   : > { %p572_p2 = scmp.lt.s32.totalorder %s2883_s25, 7  ;;  %s3856_s2 = sld [smem:[#allocation13_spill]] }
  0x3d   : > { %p3857_p3 = scmp.ne.s32.totalorder %s2883_s25, 0 }
  0x3e   : > { %s573_s30 = scalar_select %p572_p2, %s2883_s25, 7 }
  0x3f   : > { %587 = sbr.rel (%p3857_p3) target bundleno = 319 (0x13f), region = 96  ;;  %s3858_s3 = sld [smem:[#allocation14_spill]] (!%p3857_p3)  ;;  %v600_v2 = vld [vmem:[#allocation8] sm:$0xff] (!%p3857_p3)  ;;  %v601_v3 = vld [vmem:[#allocation8 + $0x8] sm:$0xff] (!%p3857_p3)  ;;  %v602_v4 = vld [vmem:[#allocation8 + $0x10] sm:$0xff] (!%p3857_p3)  ;;  %vm737_vm0 = vcmask (!%p3857_p3), 7168  }
  0x40   : > { %s1954_s18 = sshll.u32 %s573_s30, 3  ;;  %v603_v5 = vld [vmem:[#allocation8 + $0x18] sm:$0xff] (!%p3857_p3)  ;;  %v2316_v6 = vpack.c.bf16 (!%p3857_p3), %v601_v3, %v600_v2  ;;  %v604_v8 = vld [vmem:[#allocation8 + $0x20] sm:$0xff] (!%p3857_p3)  ;;  %v605_v9 = vld [vmem:[#allocation8 + $0x28] sm:$0xff] (!%p3857_p3)  ;;  %s3859_s29 = sld [smem:[#allocation11_spill]] (!%p3857_p3)  ;;  %v2777_v34 = vmov (!%p3857_p3), 0.0  }
  0x41   : > { %s2958_s0 = scalar_lea.vmem %s3845_s16, %s1954_s18  ;;  %s2963_s1 = scalar_lea.vmem %s3846_s17, %s1954_s18  ;;  %v2320_v7 = vpack.c.bf16 (!%p3857_p3), %v603_v5, %v602_v4  ;;  %v2324_v10 = vpack.c.bf16 (!%p3857_p3), %v605_v9, %v604_v8  ;;  %v606_v13 = vld [vmem:[#allocation8 + $0x30] sm:$0xff] (!%p3857_p3)  ;;  %v607_v14 = vld [vmem:[#allocation8 + $0x38] sm:$0xff] (!%p3857_p3)  ;;  %v608_v16 = vld [vmem:[#allocation8 + $0x40] sm:$0xff] (!%p3857_p3)  ;;  %v2778_v35 = vmov (!%p3857_p3), 0  }
  0x42   : > { %s2953_s23 = scalar_lea.vmem %s3856_s2, %s1954_s18  ;;  %2317 = vmatprep.subr.bf16.mxu0 (!%p3857_p3), %v2316_v6  ;;  %2604 = vmatprep.subr.bf16.mxu1 (!%p3857_p3), %v2316_v6  ;;  %v2328_v15 = vpack.c.bf16 (!%p3857_p3), %v607_v14, %v606_v13  ;;  %v609_v17 = vld [vmem:[#allocation8 + $0x48] sm:$0xff] (!%p3857_p3)  ;;  %v610_v19 = vld [vmem:[#allocation8 + $0x50] sm:$0xff] (!%p3857_p3)  ;;  %v611_v20 = vld [vmem:[#allocation8 + $0x58] sm:$0xff] (!%p3857_p3)  ;;  %736 = vst [vmem:[%s2958_s0] sm:$0xff] (!%p3857_p3), %v2777_v34 }
  0x43   : > { %v590_v1 = vld [vmem:[%s2953_s23] sm:$0xff] (!%p3857_p3)  ;;  %2319 = vmatpush3.bf16.msra.mxu0 (!%p3857_p3), %v2316_v6  ;;  %2612 = vmatpush3.bf16.msra.mxu1 (!%p3857_p3), %v2316_v6  ;;  %v2332_v18 = vpack.c.bf16 (!%p3857_p3), %v609_v17, %v608_v16  ;;  %v2336_v21 = vpack.c.bf16 (!%p3857_p3), %v611_v20, %v610_v19  ;;  %v612_v22 = vld [vmem:[#allocation8 + $0x60] sm:$0xff] (!%p3857_p3)  ;;  %v613_v23 = vld [vmem:[#allocation8 + $0x68] sm:$0xff] (!%p3857_p3)  ;;  %738 = vst.msk [vmem:[%s2963_s1] sm:$0xff] (!%p3857_p3), %vm737_vm0, %v2778_v35 }
  0x44   : > { %591 = vst [vmem:[#allocation3] sm:$0xff] (!%p3857_p3), %v590_v1  ;;  %2321 = vmatprep.subr.bf16.mxu0 (!%p3857_p3), %v2320_v7  ;;  %2605 = vmatprep.subr.bf16.mxu1 (!%p3857_p3), %v2320_v7  ;;  %v2340_v24 = vpack.c.bf16 (!%p3857_p3), %v613_v23, %v612_v22  ;;  %v614_v25 = vld [vmem:[#allocation8 + $0x70] sm:$0xff] (!%p3857_p3)  ;;  %v615_v26 = vld [vmem:[#allocation8 + $0x78] sm:$0xff] (!%p3857_p3) }
  0x45   : > { %v588_v0 = vld [vmem:[%s3858_s3] sm:$0xff] (!%p3857_p3)  ;;  %v2344_v27 = vpack.c.bf16 (!%p3857_p3), %v615_v26, %v614_v25 }
  0x46   : > { %589 = vst [vmem:[#allocation2] sm:$0xff] %v588_v0  ;;  %v592_v11 = vld [vmem:[%s3859_s29] sm:$0xff]  ;;  %v593_v28 = vld [vmem:[%s3859_s29 + $0x8] sm:$0xff]  ;;  %v594_v30 = vld [vmem:[%s3859_s29 + $0x10] sm:$0xff] }
  0x47   : > { %v596_v12 = vld [vmem:[%s3859_s29 + $0x20] sm:$0xff]  ;;  %2164 = vmatprep.mubr.f32.mxu0 %v592_v11  ;;  %2323 = vmatpush3.bf16.msra.mxu0 %v2320_v7  ;;  %v597_v29 = vld [vmem:[%s3859_s29 + $0x28] sm:$0xff]  ;;  %v598_v31 = vld [vmem:[%s3859_s29 + $0x30] sm:$0xff] }
  0x48   : > { %2170 = vmatprep.mubr.f32.mxu1 %v596_v12  ;;  %2613 = vmatpush3.bf16.msra.mxu1 %v2320_v7  ;;  %v595_v32 = vld [vmem:[%s3859_s29 + $0x18] sm:$0xff]  ;;  %v1958_v36 = vld [vmem:[%s3837_s8] ss:$0 sm:$0xff] }
  0x49   : > { %2325 = vmatprep.subr.bf16.mxu0 %v2324_v10  ;;  %2606 = vmatprep.subr.bf16.mxu1 %v2324_v10  ;;  %v599_v33 = vld [vmem:[%s3859_s29 + $0x38] sm:$0xff] }
  0x4b   : > { %2327 = vmatpush3.bf16.msra.mxu0 %v2324_v10 }
  0x4c   : > { %2614 = vmatpush3.bf16.msra.mxu1 %v2324_v10  ;;  %2329 = vmatprep.subr.bf16.mxu0 %v2328_v15 }
  0x4d   : > { %2607 = vmatprep.subr.bf16.mxu1 %v2328_v15 }
  0x4f   : > { %2331 = vmatpush3.bf16.msra.mxu0 %v2328_v15 }
  0x50   : > { %2615 = vmatpush3.bf16.msra.mxu1 %v2328_v15  ;;  %2333 = vmatprep.subr.bf16.mxu0 %v2332_v18 }
  0x51   : > { %2608 = vmatprep.subr.bf16.mxu1 %v2332_v18 }
  0x53   : > { %2335 = vmatpush3.bf16.msra.mxu0 %v2332_v18 }
  0x54   : > { %2616 = vmatpush3.bf16.msra.mxu1 %v2332_v18  ;;  %2337 = vmatprep.subr.bf16.mxu0 %v2336_v21 }
  0x55   : > { %2609 = vmatprep.subr.bf16.mxu1 %v2336_v21 }
  0x57   : > { %2339 = vmatpush3.bf16.msra.mxu0 %v2336_v21 }
  0x58   : > { %2617 = vmatpush3.bf16.msra.mxu1 %v2336_v21  ;;  %2341 = vmatprep.subr.bf16.mxu0 %v2340_v24 }
  0x59   : > { %2610 = vmatprep.subr.bf16.mxu1 %v2340_v24 }
  0x5b   : > { %2343 = vmatpush3.bf16.msra.mxu0 %v2340_v24 }
  0x5c   : > { %2618 = vmatpush3.bf16.msra.mxu1 %v2340_v24  ;;  %2345 = vmatprep.subr.bf16.mxu0 %v2344_v27 }
  0x5d   : > { %2611 = vmatprep.subr.bf16.mxu1 %v2344_v27 }
  0x5f   : > { %2347 = vmatpush3.bf16.msra.mxu0 %v2344_v27 }
  0x60   : > { %2619 = vmatpush3.bf16.msra.mxu1 %v2344_v27 }
  0x62   : > { %2165 = vmatmul.mubr.f32.vlgmr.msra.gmra.mrb[0].mxu0 %v593_v28 }
  0x63   : > { %2171 = vmatmul.mubr.f32.vlgmr.msra.gmra.mrb[0].mxu1 %v597_v29  ;;  %2167 = vmatprep.mubr.f32.mxu0 %v594_v30 }
  0x64   : > { %2173 = vmatprep.mubr.f32.mxu1 %v598_v31 }
  0x66   : > { %2168 = vmatmul.mubr.f32.gmra.mrb[2].mxu0 %v595_v32 }
  0x67   : > { %2174 = vmatmul.mubr.f32.gmra.mrb[2].mxu1 %v599_v33 }
 0x135   : > { %v2166_v37 = vpop.f32.mrb[0].mxu0 }
 0x136   : > { %v2172_v38 = vpop.f32.mrb[0].mxu1  ;;  %v695_v39 = vadd.f32 %v2166_v37, %v1958_v36  ;;  %v689_v41 = vpop.f32.mrb[1].mxu0 }
 0x137   : > { %v715_v40 = vadd.f32 %v2172_v38, %v1958_v36  ;;  %v709_v42 = vpop.f32.mrb[1].mxu1  ;;  %v690_v43 = vadd.f32 %v1958_v36, %v689_v41 }
 0x138   : > { %v710_v44 = vadd.f32 %v1958_v36, %v709_v42  ;;  %729 = vst [vmem:[#allocation4 + $0x8] sm:$0xff] %v695_v39 }
 0x139   : > { %733 = vst [vmem:[#allocation4 + $0x28] sm:$0xff] %v715_v40  ;;  %728 = vst [vmem:[#allocation4] sm:$0xff] %v690_v43  ;;  %v2169_v45 = vpop.f32.mrb[2].mxu0 }
 0x13a   : > { %732 = vst [vmem:[#allocation4 + $0x20] sm:$0xff] %v710_v44  ;;  %v2175_v46 = vpop.f32.mrb[2].mxu1  ;;  %v705_v47 = vadd.f32 %v2169_v45, %v1958_v36  ;;  %v699_v49 = vpop.f32.mrb[3].mxu0 }
 0x13b   : > { %v725_v48 = vadd.f32 %v2175_v46, %v1958_v36  ;;  %v719_v50 = vpop.f32.mrb[3].mxu1  ;;  %v700_v51 = vadd.f32 %v1958_v36, %v699_v49 }
 0x13c   : > { %v720_v52 = vadd.f32 %v1958_v36, %v719_v50  ;;  %731 = vst [vmem:[#allocation4 + $0x18] sm:$0xff] %v705_v47 }
 0x13d   : > { %735 = vst [vmem:[#allocation4 + $0x38] sm:$0xff] %v725_v48  ;;  %730 = vst [vmem:[#allocation4 + $0x10] sm:$0xff] %v700_v51 }
 0x13e   : > { %734 = vst [vmem:[#allocation4 + $0x30] sm:$0xff] %v720_v52 }
 0x13f PF: > { %p1959_p4 = scmp.le.s32.totalorder %s2883_s25, 0 }
 0x140   : > { %v745_v53 = vld [vmem:[%s3835_s6] sm:$0xff] (!%p1959_p4)  ;;  %v746_v54 = vld [vmem:[%s3835_s6 + $0x8] sm:$0xff] (!%p1959_p4)  ;;  %v747_v55 = vld [vmem:[%s3835_s6 + $0x10] sm:$0xff] (!%p1959_p4)  ;;  %v2779_v56 = vmov (!%p1959_p4), 0.0|0.0   ;;  %vm2780_vm1 = vmmov (!%p1959_p4), 0   ;;  %v2781_v59 = vmov (!%p1959_p4), 0.0  }
 0x141   : > { %742 = sbr.rel (%p1959_p4) target bundleno = 2142 (0x85e), region = 100  ;;  %2348 = vmatprep.subr.bf16.mxu0 (!%p1959_p4), %v2779_v56  ;;  %v2349_v57 = vpack.c.bf16 (!%p1959_p4), %v746_v54, %v745_v53  ;;  %v748_v58 = vld [vmem:[%s3835_s6 + $0x18] sm:$0xff] (!%p1959_p4)  ;;  %2208 = vmatprep.mubr.msk.f32.mxu0 (!%p1959_p4), %vm2780_vm1, %v2781_v59  ;;  %v749_v61 = vld [vmem:[%s3835_s6 + $0x20] sm:$0xff] (!%p1959_p4)  ;;  %v750_v62 = vld [vmem:[%s3835_s6 + $0x28] sm:$0xff] (!%p1959_p4)  ;;  %v2782_v51 = vmov (!%p1959_p4), 0   ;;  %s3860_s27 = sld [smem:[#allocation12_spill]] (!%p1959_p4) }
 0x142   : > { %v2352_v60 = vpack.c.bf16 (!%p1959_p4), %v748_v58, %v747_v55  ;;  %v2355_v63 = vpack.c.bf16 (!%p1959_p4), %v750_v62, %v749_v61  ;;  %v751_v0 = vld [vmem:[%s3835_s6 + $0x30] sm:$0xff] (!%p1959_p4)  ;;  %v752_v1 = vld [vmem:[%s3835_s6 + $0x38] sm:$0xff] (!%p1959_p4)  ;;  %v753_v3 = vld [vmem:[%s3835_s6 + $0x40] sm:$0xff] (!%p1959_p4)  ;;  %2668 = vset.pattern.permute.xlu1 (!%p1959_p4), %v2782_v51  ;;  %2667 = vset.pattern.permute.xlu0 (!%p1959_p4), %v2782_v51  ;;  %vm910_vm7 = vcmask (!%p1959_p4), 7168   ;;  %s3861_s3 = sld [smem:[#allocation11_spill]] (!%p1959_p4) }
 0x143   : > { %2350 = vmatpush3.bf16.msra.mxu0 (!%p1959_p4), %v2349_v57  ;;  %v2358_v2 = vpack.c.bf16 (!%p1959_p4), %v752_v1, %v751_v0  ;;  %v754_v4 = vld [vmem:[%s3835_s6 + $0x48] sm:$0xff] (!%p1959_p4)  ;;  %v755_v6 = vld [vmem:[%s3835_s6 + $0x50] sm:$0xff] (!%p1959_p4)  ;;  %v756_v7 = vld [vmem:[%s3835_s6 + $0x58] sm:$0xff] (!%p1959_p4)  ;;  %s1736_s19 = sld [smem:[#allocation5 + %s2883_s25]] (!%p1959_p4) }
 0x144   : > { %2351 = vmatprep.subr.bf16.mxu0 (!%p1959_p4), %v2779_v56  ;;  %v2361_v5 = vpack.c.bf16 (!%p1959_p4), %v754_v4, %v753_v3  ;;  %v2364_v8 = vpack.c.bf16 (!%p1959_p4), %v756_v7, %v755_v6  ;;  %v757_v9 = vld [vmem:[%s3835_s6 + $0x60] sm:$0xff] (!%p1959_p4)  ;;  %v758_v10 = vld [vmem:[%s3835_s6 + $0x68] sm:$0xff] (!%p1959_p4)  ;;  %v759_v12 = vld [vmem:[%s3835_s6 + $0x70] sm:$0xff] (!%p1959_p4) }
 0x145   : > { %v2367_v11 = vpack.c.bf16 (!%p1959_p4), %v758_v10, %v757_v9  ;;  %v760_v13 = vld [vmem:[%s3835_s6 + $0x78] sm:$0xff] (!%p1959_p4)  ;;  %v833_v16 = vld [vmem:[#allocation4 + $0x10] sm:$0xff] (!%p1959_p4)  ;;  %v831_v17 = vld [vmem:[#allocation4] sm:$0xff] (!%p1959_p4) }
 0x146   : > { %v2370_v14 = vpack.c.bf16 (!%p1959_p4), %v760_v13, %v759_v12  ;;  %v3059_v15 = vld [vmem:[#allocation2] sm:$0xff] (!%p1959_p4)  ;;  %v834_v18 = vld [vmem:[#allocation4 + $0x18] sm:$0xff] (!%p1959_p4)  ;;  %v832_v19 = vld [vmem:[#allocation4 + $0x8] sm:$0xff] (!%p1959_p4) }
 0x147   : > { %2353 = vmatpush3.bf16.msra.mxu0 (!%p1959_p4), %v2352_v60  ;;  %v836_v26 = vld [vmem:[#allocation4 + $0x28] sm:$0xff] (!%p1959_p4)  ;;  %v835_v27 = vld [vmem:[#allocation4 + $0x20] sm:$0xff] (!%p1959_p4)  ;;  %v838_v30 = vld [vmem:[#allocation4 + $0x38] sm:$0xff] (!%p1959_p4) }
 0x148   : > { %2354 = vmatprep.subr.bf16.mxu0 %v2779_v56  ;;  %v837_v31 = vld [vmem:[#allocation4 + $0x30] sm:$0xff]  ;;  %v1038_v52 = vld [vmem:[%s3839_s10 + $0x8] sm:$0xff]  ;;  %v1040_v57 = vld [vmem:[%s3839_s10 + $0x18] sm:$0xff] }
 0x149   : > { %v1960_v34 = vld [vmem:[%s3838_s9] ss:$0 sm:$0xff]  ;;  %v1044_v58 = vld [vmem:[%s3839_s10 + $0x38] sm:$0xff]  ;;  %v1047_v60 = vld [vmem:[%s3839_s10 + $0x50] sm:$0xff]  ;;  %p1964_p6 = scmp.le.s32.totalorder %s1736_s19, 0 }
 0x14a   : > { %v1041_v53 = vld [vmem:[%s3839_s10 + $0x20] sm:$0xff]  ;;  %v2376_v62 = vpack.c.bf16 %v1047_v60, %v1044_v58  ;;  %v1046_v0 = vld [vmem:[%s3839_s10 + $0x48] sm:$0xff]  ;;  %v1052_v6 = vld [vmem:[%s3839_s10 + $0x78] sm:$0xff] }
 0x14b   : > { %2356 = vmatpush3.bf16.msra.mxu0 %v2355_v63  ;;  %v1037_v54 = vld [vmem:[%s3839_s10] sm:$0xff]  ;;  %v2372_v55 = vpack.c.bf16 %v1041_v53, %v1038_v52  ;;  %v1043_v63 = vld [vmem:[%s3839_s10 + $0x30] sm:$0xff]  ;;  %v1050_v1 = vld [vmem:[%s3839_s10 + $0x68] sm:$0xff] }
 0x14c   : > { %2357 = vmatprep.subr.bf16.mxu0 %v2779_v56  ;;  %v2374_v61 = vpack.c.bf16 %v1040_v57, %v1037_v54  ;;  %v2378_v3 = vpack.c.bf16 %v1046_v0, %v1043_v63  ;;  %v1056_v7 = vld [vmem:[%s3839_s10 + $0x98] sm:$0xff]  ;;  %v1058_v12 = vld [vmem:[%s3839_s10 + $0xa8] sm:$0xff]  ;;  %v886_v53 = vld [vmem:[%s3860_s27] sm:$0xff] }
 0x14d   : > { %2373 = vmatprep.subr.bf16.mxu1 %v2372_v55  ;;  %v1062_v13 = vld [vmem:[%s3839_s10 + $0xc8] sm:$0xff]  ;;  %v889_v55 = vld [vmem:[%s3860_s27 + $0x18] sm:$0xff]  ;;  %v890_v60 = vld [vmem:[%s3860_s27 + $0x20] sm:$0xff]  ;;  %vm894_vm2 = vcmp.gt.f32.partialorder %v886_v53, 0.0 }
 0x14e   : > { %2375 = vmatpush1.bf16.msra.mxu1 %v2374_v61  ;;  %v891_v54 = vld [vmem:[%s3860_s27 + $0x28] sm:$0xff]  ;;  %v893_v63 = vld [vmem:[%s3860_s27 + $0x38] sm:$0xff]  ;;  %vm897_vm4 = vcmp.gt.f32.partialorder %v889_v55, 0.0  ;;  %vm898_vm6 = vcmp.gt.f32.partialorder %v890_v60, 0.0 }
 0x14f   : > { %2359 = vmatpush3.bf16.msra.mxu0 %v2358_v2  ;;  %v1053_v2 = vld [vmem:[%s3839_s10 + $0x80] sm:$0xff]  ;;  %2377 = vmatprep.subr.bf16.mxu1 %v2376_v62  ;;  %v887_v58 = vld [vmem:[%s3860_s27 + $0x8] sm:$0xff]  ;;  %v888_v62 = vld [vmem:[%s3860_s27 + $0x10] sm:$0xff]  ;;  %vm899_vm3 = vcmp.gt.f32.partialorder %v891_v54, 0.0  ;;  %vm901_vm9 = vcmp.gt.f32.partialorder %v893_v63, 0.0 }
 0x150   : > { %2360 = vmatprep.subr.bf16.mxu0 %v2779_v56  ;;  %v2380_v4 = vpack.c.bf16 %v1053_v2, %v1050_v1  ;;  %vm895_vm5 = vcmp.gt.f32.partialorder %v887_v58, 0.0  ;;  %v892_v1 = vld [vmem:[%s3860_s27 + $0x30] sm:$0xff]  ;;  %vm896_vm8 = vcmp.gt.f32.partialorder %v888_v62, 0.0 }
 0x151   : > { %vm900_vm10 = vcmp.gt.f32.partialorder %v892_v1, 0.0 }
 0x152   : > { %2379 = vmatpush1.bf16.msra.mxu1 %v2378_v3 }
 0x153   : > { %2362 = vmatpush3.bf16.msra.mxu0 %v2361_v5  ;;  %v1049_v5 = vld [vmem:[%s3839_s10 + $0x60] sm:$0xff]  ;;  %2381 = vmatprep.subr.bf16.mxu1 %v2380_v4 }
 0x154   : > { %2363 = vmatprep.subr.bf16.mxu0 %v2779_v56  ;;  %v2382_v9 = vpack.c.bf16 %v1052_v6, %v1049_v5 }
 0x156   : > { %2383 = vmatpush1.bf16.msra.mxu1 %v2382_v9 }
 0x157   : > { %2365 = vmatpush3.bf16.msra.mxu0 %v2364_v8  ;;  %v1059_v8 = vld [vmem:[%s3839_s10 + $0xb0] sm:$0xff] }
 0x158   : > { %2366 = vmatprep.subr.bf16.mxu0 %v2779_v56  ;;  %v2384_v10 = vpack.c.bf16 %v1059_v8, %v1056_v7 }
 0x15a   : > { %2385 = vmatprep.subr.bf16.mxu1 %v2384_v10 }
 0x15b   : > { %2368 = vmatpush3.bf16.msra.mxu0 %v2367_v11  ;;  %v1055_v11 = vld [vmem:[%s3839_s10 + $0x90] sm:$0xff] }
 0x15c   : > { %2369 = vmatprep.subr.bf16.mxu0 %v2779_v56 }
 0x15f   : > { %2371 = vmatpush3.bf16.msra.mxu0 %v2370_v14  ;;  %v1065_v14 = vld [vmem:[%s3839_s10 + $0xe0] sm:$0xff] }
 0x162   : > { %2209 = vmatmul.mubr.f32.vlgmr.msra.gmra.mrb[0].mxu0 %v3059_v15 }
 0x235   : > { %v827_v20 = vpop.f32.mrb[0].mxu0 }
 0x236   : > { %v2210_v21 = vpop.f32.mrb[1].mxu0  ;;  %v841_v22 = vadd.f32 %v833_v16, %v827_v20  ;;  %v839_v23 = vadd.f32 %v831_v17, %v827_v20  ;;  %v842_v24 = vadd.f32 %v834_v18, %v827_v20  ;;  %v840_v25 = vadd.f32 %v832_v19, %v827_v20  ;;  %v1087_v16 = vld [vmem:[%s3839_s10 + $0x190] sm:$0xff]  ;;  %v1090_v17 = vld [vmem:[%s3839_s10 + $0x1a8] sm:$0xff] }
 0x237   : > { %v844_v28 = vadd.f32 %v836_v26, %v827_v20  ;;  %v843_v29 = vadd.f32 %v835_v27, %v827_v20  ;;  %v846_v32 = vadd.f32 %v838_v30, %v827_v20  ;;  %v845_v33 = vadd.f32 %v837_v31, %v827_v20  ;;  %v1039_v20 = vld [vmem:[%s3839_s10 + $0x10] sm:$0xff]  ;;  %v1070_v31 = vld [vmem:[%s3839_s10 + $0x108] sm:$0xff] }
 0x238   : > { %2669 = vtanh.f32 %v841_v22  ;;  %v2386_v18 = vpack.c.bf16 %v1058_v12, %v1055_v11  ;;  %v2436_v19 = vpack.c.bf16 %v1090_v17, %v1087_v16  ;;  %v2388_v21 = vpack.c.bf16 %v1065_v14, %v1062_v13  ;;  %v1061_v22 = vld [vmem:[%s3839_s10 + $0xc0] sm:$0xff]  ;;  %v1071_v26 = vld [vmem:[%s3839_s10 + $0x110] sm:$0xff] }
 0x239   : > { %2671 = vtanh.f32 %v839_v23  ;;  %v1064_v23 = vld [vmem:[%s3839_s10 + $0xd8] sm:$0xff]  ;;  %v1067_v30 = vld [vmem:[%s3839_s10 + $0xf0] sm:$0xff] }
 0x23a   : > { %2673 = vtanh.f32 %v842_v24  ;;  %v1042_v24 = vld [vmem:[%s3839_s10 + $0x28] sm:$0xff]  ;;  %2437 = vmatprep.subr.bf16.mxu0 %v2436_v19  ;;  %2387 = vmatpush1.bf16.msra.mxu1 %v2386_v18 }
 0x23b   : > { %2675 = vtanh.f32 %v840_v25  ;;  %v1068_v25 = vld [vmem:[%s3839_s10 + $0xf8] sm:$0xff]  ;;  %v2438_v27 = vpack.c.bf16 %v1042_v24, %v1039_v20  ;;  %2389 = vmatprep.subr.bf16.mxu1 %v2388_v21 }
 0x23c   : > { %2677 = vtanh.f32 %v844_v28  ;;  %v2390_v28 = vpack.c.bf16 %v1064_v23, %v1061_v22 }
 0x23d   : > { %2679 = vtanh.f32 %v843_v29  ;;  %2439 = vmatpush3.bf16.msra.mxu0 %v2438_v27  ;;  %v2392_v29 = vpack.c.bf16 %v1071_v26, %v1068_v25 }
 0x23e   : > { %2681 = vtanh.f32 %v846_v32  ;;  %v1074_v32 = vld [vmem:[%s3839_s10 + $0x128] sm:$0xff]  ;;  %2391 = vmatpush1.bf16.msra.mxu1 %v2390_v28 }
 0x23f   : > { %2683 = vtanh.f32 %v845_v33  ;;  %v1077_v33 = vld [vmem:[%s3839_s10 + $0x140] sm:$0xff]  ;;  %2393 = vmatprep.subr.bf16.mxu1 %v2392_v29 }
 0x242   : > { %v2670_v35 = vpop.eup %2669 }
 0x243   : > { %v2672_v36 = vpop.eup %2671  ;;  %v864_v37 = vmul.f32 %v2670_v35, %v1960_v34  ;;  %v2396_v35 = vpack.c.bf16 %v1077_v33, %v1074_v32 }
 0x244   : > { %v2674_v38 = vpop.eup %2673  ;;  %v862_v39 = vmul.f32 %v2672_v36, %v1960_v34  ;;  %v1073_v36 = vld [vmem:[%s3839_s10 + $0x120] sm:$0xff] }
 0x245   : > { %v2676_v40 = vpop.eup %2675  ;;  %874 = vadd.xlane.f32.xlu1 %v864_v37  ;;  %v865_v41 = vmul.f32 %v2674_v38, %v1960_v34  ;;  %v1076_v37 = vld [vmem:[%s3839_s10 + $0x138] sm:$0xff] }
 0x246   : > { %870 = vadd.xlane.f32.xlu0 %v862_v39  ;;  %v2678_v42 = vpop.eup %2677  ;;  %v863_v43 = vmul.f32 %v2676_v40, %v1960_v34  ;;  %v1080_v38 = vld [vmem:[%s3839_s10 + $0x158] sm:$0xff]  ;;  %v1083_v39 = vld [vmem:[%s3839_s10 + $0x170] sm:$0xff]  ;;  %v2398_v40 = vpack.c.bf16 %v1076_v37, %v1073_v36 }
 0x247   : > { %v2680_v44 = vpop.eup %2679  ;;  %v867_v45 = vmul.f32 %v2678_v42, %v1960_v34  ;;  %v1079_v42 = vld [vmem:[%s3839_s10 + $0x150] sm:$0xff] }
 0x248   : > { %v2682_v46 = vpop.eup %2681  ;;  %v866_v47 = vmul.f32 %v2680_v44, %v1960_v34  ;;  %v1086_v44 = vld [vmem:[%s3839_s10 + $0x188] sm:$0xff] }
 0x249   : > { %876 = vadd.xlane.f32.xlu1 %v865_v41  ;;  %v2684_v48 = vpop.eup %2683  ;;  %v869_v49 = vmul.f32 %v2682_v46, %v1960_v34  ;;  %v2400_v41 = vpack.c.bf16 %v1083_v39, %v1080_v38 }
 0x24a   : > { %872 = vadd.xlane.f32.xlu0 %v863_v43  ;;  %v868_v50 = vmul.f32 %v2684_v48, %v1960_v34  ;;  %v2394_v34 = vpack.c.bf16 %v1070_v31, %v1067_v30  ;;  %v1082_v43 = vld [vmem:[%s3839_s10 + $0x168] sm:$0xff]  ;;  %v1085_v48 = vld [vmem:[%s3839_s10 + $0x180] sm:$0xff] }
 0x24b   : > { %v2402_v46 = vpack.c.bf16 %v1082_v43, %v1079_v42 }
 0x24c   : > { %2395 = vmatpush1.bf16.msra.mxu1 %v2394_v34 }
 0x24d   : > { %880 = vadd.xlane.f32.xlu1 %v867_v45  ;;  %2397 = vmatprep.subr.bf16.mxu1 %v2396_v35  ;;  %v1089_v45 = vld [vmem:[%s3839_s10 + $0x1a0] sm:$0xff] }
 0x24e   : > { %878 = vadd.xlane.f32.xlu0 %v866_v47  ;;  %v2404_v47 = vpack.c.bf16 %v1089_v45, %v1086_v44 }
 0x250   : > { %2399 = vmatpush1.bf16.msra.mxu1 %v2398_v40 }
 0x251   : > { %884 = vadd.xlane.f32.xlu1 %v869_v49  ;;  %2401 = vmatprep.subr.bf16.mxu1 %v2400_v41  ;;  %v1088_v49 = vld [vmem:[%s3839_s10 + $0x198] sm:$0xff] }
 0x252   : > { %882 = vadd.xlane.f32.xlu0 %v868_v50  ;;  %v2406_v50 = vpack.c.bf16 %v1088_v49, %v1085_v48 }
 0x254   : > { %2403 = vmatpush1.bf16.msra.mxu1 %v2402_v46 }
 0x255   : > { %2405 = vmatprep.subr.bf16.mxu1 %v2404_v47 }
 0x258   : > { %2407 = vmatpush1.bf16.msra.mxu1 %v2406_v50 }
 0x2d2   : > { %v875_v51 = vpop.xlane.xlu1 %874 }
 0x2d3   : > { %v871_v52 = vpop.xlane.xlu0 %870  ;;  %v904_v10 = vsel %vm896_vm8, %v875_v51, -1e+09 }
 0x2d4   : > { %v902_v2 = vsel %vm894_vm2, %v871_v52, -1e+09  ;;  %v913_v22 = vsel %vm910_vm7, %v904_v10, -inf }
 0x2d5   : > { %v911_v12 = vsel %vm910_vm7, %v902_v2, -inf }
 0x2d6   : > { %v877_v57 = vpop.xlane.xlu1 %876 }
 0x2d7   : > { %v873_v61 = vpop.xlane.xlu0 %872  ;;  %v905_v5 = vsel %vm897_vm4, %v877_v57, -1e+09 }
 0x2d8   : > { %v903_v6 = vsel %vm895_vm5, %v873_v61, -1e+09  ;;  %v914_v13 = vsel %vm910_vm7, %v905_v5, -inf }
 0x2d9   : > { %v912_v14 = vsel %vm910_vm7, %v903_v6, -inf }
 0x2da   : > { %v881_v0 = vpop.xlane.xlu1 %880 }
 0x2db   : > { %v907_v3 = vsel %vm899_vm3, %v881_v0, -1e+09  ;;  %v879_v4 = vpop.xlane.xlu0 %878 }
 0x2dc   : > { %v906_v7 = vsel %vm898_vm6, %v879_v4, -1e+09  ;;  %v917_v8 = vsel %vm910_vm7, %v907_v3, -inf }
 0x2dd   : > { %v915_v9 = vsel %vm910_vm7, %v906_v7, -inf  ;;  %v918_v18 = vmax.f32 %v912_v14, %v917_v8  ;;  %v1096_v14 = vld [vmem:[%s3839_s10 + $0x1d8] sm:$0xff] }
 0x2de   : > { %v885_v11 = vpop.xlane.xlu1 %884  ;;  %v916_v19 = vmax.f32 %v911_v12, %v915_v9  ;;  %v1093_v12 = vld [vmem:[%s3839_s10 + $0x1c0] sm:$0xff] }
 0x2df   : > { %v909_v16 = vsel %vm901_vm9, %v885_v11, -1e+09  ;;  %v883_v17 = vpop.xlane.xlu0 %882  ;;  %v1095_v11 = vld [vmem:[%s3839_s10 + $0x1d0] sm:$0xff] }
 0x2e0   : > { %v921_v20 = vsel %vm910_vm7, %v909_v16, -inf  ;;  %v908_v21 = vsel %vm900_vm10, %v883_v17, -1e+09  ;;  %v923_v26 = vmax.f32 %v916_v19, %v918_v18  ;;  %v1094_v17 = vld [vmem:[%s3839_s10 + $0x1c8] sm:$0xff]  ;;  %v2440_v18 = vpack.c.bf16 %v1096_v14, %v1093_v12  ;;  %v1069_v12 = vld [vmem:[%s3839_s10 + $0x100] sm:$0xff] }
 0x2e1   : > { %v922_v23 = vmax.f32 %v914_v13, %v921_v20  ;;  %v919_v24 = vsel %vm910_vm7, %v908_v21, -inf  ;;  %v1045_v20 = vld [vmem:[%s3839_s10 + $0x40] sm:$0xff] }
 0x2e2   : > { %v920_v25 = vmax.f32 %v913_v22, %v919_v24  ;;  %2441 = vmatprep.subr.bf16.mxu0 %v2440_v18  ;;  %v1098_v24 = vld [vmem:[%s3839_s10 + $0x1e8] sm:$0xff]  ;;  %v1125_v18 = vld [vmem:[%s3839_s10 + $0x2c0] sm:$0xff] }
 0x2e4   : > { %v924_v27 = vmax.f32 %v920_v25, %v922_v23  ;;  %v1101_v25 = vld [vmem:[%s3839_s10 + $0x200] sm:$0xff] }
 0x2e6   : > { %v925_v28 = vmax.f32 %v923_v26, %v924_v27  ;;  %v1099_v26 = vld [vmem:[%s3839_s10 + $0x1f0] sm:$0xff]  ;;  %v2412_v27 = vpack.c.bf16 %v1101_v25, %v1098_v24  ;;  %v1078_v25 = vld [vmem:[%s3839_s10 + $0x148] sm:$0xff] }
 0x2e7   : > { %v1075_v24 = vld [vmem:[%s3839_s10 + $0x130] sm:$0xff] }
 0x2e8   : > { %v926_v29 = vsub.f32 %v902_v2, %v925_v28  ;;  %v927_v30 = vsub.f32 %v903_v6, %v925_v28  ;;  %v928_v31 = vsub.f32 %v904_v10, %v925_v28  ;;  %v929_v32 = vsub.f32 %v905_v5, %v925_v28  ;;  %v1092_v10 = vld [vmem:[%s3839_s10 + $0x1b8] sm:$0xff] }
 0x2e9   : > { %v930_v33 = vsub.f32 %v906_v7, %v925_v28  ;;  %v931_v37 = vsub.f32 %v907_v3, %v925_v28  ;;  %v932_v39 = vsub.f32 %v908_v21, %v925_v28  ;;  %v933_v41 = vsub.f32 %v909_v16, %v925_v28  ;;  %v1091_v16 = vld [vmem:[%s3839_s10 + $0x1b0] sm:$0xff]  ;;  %v1048_v21 = vld [vmem:[%s3839_s10 + $0x58] sm:$0xff]  ;;  %v1102_v28 = vld [vmem:[%s3839_s10 + $0x208] sm:$0xff] }
 0x2ea   : > { %v934_v34 = vmul.f32 1.442695, %v926_v29  ;;  %v936_v35 = vmul.f32 1.442695, %v927_v30  ;;  %v938_v36 = vmul.f32 1.442695, %v928_v31  ;;  %v2408_v13 = vpack.c.bf16 %v1095_v11, %v1092_v10 }
 0x2eb   : > { %v940_v38 = vmul.f32 1.442695, %v929_v32  ;;  %v942_v40 = vmul.f32 1.442695, %v930_v33  ;;  %v944_v42 = vmul.f32 1.442695, %v931_v37  ;;  %v2410_v19 = vpack.c.bf16 %v1094_v17, %v1091_v16 }
 0x2ec   : > { %2685 = vpow2.f32 %v934_v34  ;;  %v946_v43 = vmul.f32 1.442695, %v932_v39  ;;  %v948_v44 = vmul.f32 1.442695, %v933_v41  ;;  %2409 = vmatprep.subr.bf16.mxu1 %v2408_v13  ;;  %v2442_v22 = vpack.c.bf16 %v1048_v21, %v1045_v20  ;;  %v1097_v29 = vld [vmem:[%s3839_s10 + $0x1e0] sm:$0xff]  ;;  %v1100_v30 = vld [vmem:[%s3839_s10 + $0x1f8] sm:$0xff] }
 0x2ed   : > { %2687 = vpow2.f32 %v936_v35  ;;  %2411 = vmatpush1.bf16.msra.mxu1 %v2410_v19  ;;  %v2444_v31 = vpack.c.bf16 %v1102_v28, %v1099_v26  ;;  %v2414_v32 = vpack.c.bf16 %v1100_v30, %v1097_v29  ;;  %v1051_v33 = vld [vmem:[%s3839_s10 + $0x70] sm:$0xff]  ;;  %v1054_v34 = vld [vmem:[%s3839_s10 + $0x88] sm:$0xff]  ;;  %v1104_v37 = vld [vmem:[%s3839_s10 + $0x218] sm:$0xff]  ;;  %v2462_v26 = vpack.c.bf16 %v1078_v25, %v1075_v24 }
 0x2ee   : > { %2689 = vpow2.f32 %v938_v36  ;;  %2443 = vmatpush3.bf16.msra.mxu0 %v2442_v22  ;;  %2413 = vmatprep.subr.bf16.mxu1 %v2412_v27  ;;  %v2446_v35 = vpack.c.bf16 %v1054_v34, %v1051_v33  ;;  %v1105_v39 = vld [vmem:[%s3839_s10 + $0x220] sm:$0xff]  ;;  %v1108_v41 = vld [vmem:[%s3839_s10 + $0x238] sm:$0xff]  ;;  %v1122_v17 = vld [vmem:[%s3839_s10 + $0x2a8] sm:$0xff] }
 0x2ef   : > { %2691 = vpow2.f32 %v940_v38  ;;  %2445 = vmatprep.subr.bf16.mxu0 %v2444_v31  ;;  %v1107_v38 = vld [vmem:[%s3839_s10 + $0x230] sm:$0xff]  ;;  %v1072_v13 = vld [vmem:[%s3839_s10 + $0x118] sm:$0xff]  ;;  %v2428_v20 = vpack.c.bf16 %v1125_v18, %v1122_v17  ;;  %v1129_v29 = vld [vmem:[%s3839_s10 + $0x2e0] sm:$0xff] }
 0x2f0   : > { %2693 = vpow2.f32 %v942_v40  ;;  %v2416_v40 = vpack.c.bf16 %v1107_v38, %v1104_v37  ;;  %v2458_v14 = vpack.c.bf16 %v1072_v13, %v1069_v12  ;;  %v1123_v19 = vld [vmem:[%s3839_s10 + $0x2b0] sm:$0xff]  ;;  %v1124_v21 = vld [vmem:[%s3839_s10 + $0x2b8] sm:$0xff]  ;;  %v1130_v33 = vld [vmem:[%s3839_s10 + $0x2e8] sm:$0xff] }
 0x2f1   : > { %2695 = vpow2.f32 %v944_v42  ;;  %2415 = vmatpush1.bf16.msra.mxu1 %v2414_v32  ;;  %v1103_v42 = vld [vmem:[%s3839_s10 + $0x210] sm:$0xff]  ;;  %v1128_v27 = vld [vmem:[%s3839_s10 + $0x2d8] sm:$0xff]  ;;  %v1292_v38 = vld [vmem:[%s3840_s11 + $0x8] sm:$0xff] }
 0x2f2   : > { %2697 = vpow2.f32 %v946_v43  ;;  %2447 = vmatpush3.bf16.msra.mxu0 %v2446_v35  ;;  %v1106_v43 = vld [vmem:[%s3839_s10 + $0x228] sm:$0xff]  ;;  %2417 = vmatprep.subr.bf16.mxu1 %v2416_v40  ;;  %v1131_v28 = vld [vmem:[%s3839_s10 + $0x2f0] sm:$0xff]  ;;  %v1132_v31 = vld [vmem:[%s3839_s10 + $0x2f8] sm:$0xff] }
 0x2f3   : > { %2699 = vpow2.f32 %v948_v44  ;;  %v2448_v44 = vpack.c.bf16 %v1108_v41, %v1105_v39  ;;  %v2432_v30 = vpack.c.bf16 %v1131_v28, %v1128_v27  ;;  %v1127_v32 = vld [vmem:[%s3839_s10 + $0x2d0] sm:$0xff]  ;;  %v2464_v34 = vpack.c.bf16 %v1132_v31, %v1129_v29  ;;  %v1084_v37 = vld [vmem:[%s3839_s10 + $0x178] sm:$0xff]  ;;  %v1295_v40 = vld [vmem:[%s3840_s11 + $0x20] sm:$0xff] }
 0x2f4   : > { %v2434_v35 = vpack.c.bf16 %v1130_v33, %v1127_v32  ;;  %v2468_v41 = vpack.c.bf16 %v1295_v40, %v1292_v38  ;;  %v1293_v12 = vld [vmem:[%s3840_s11 + $0x10] sm:$0xff]  ;;  %v1296_v13 = vld [vmem:[%s3840_s11 + $0x28] sm:$0xff]  ;;  %v1298_v17 = vld [vmem:[%s3840_s11 + $0x38] sm:$0xff] }
 0x2f5   : > { %2449 = vmatprep.subr.bf16.mxu0 %v2448_v44  ;;  %v975_v44 = vld [vmem:[%s3861_s3 + $0x8] sm:$0xff]  ;;  %v1301_v18 = vld [vmem:[%s3840_s11 + $0x50] sm:$0xff]  ;;  %v1299_v24 = vld [vmem:[%s3840_s11 + $0x40] sm:$0xff] }
 0x2f6   : > { %v2686_v45 = vpop.eup %2685  ;;  %v1302_v25 = vld [vmem:[%s3840_s11 + $0x58] sm:$0xff]  ;;  %v1307_v27 = vld [vmem:[%s3840_s11 + $0x80] sm:$0xff]  ;;  %v1305_v33 = vld [vmem:[%s3840_s11 + $0x70] sm:$0xff] }
 0x2f7   : > { %v2688_v46 = vpop.eup %2687  ;;  %v950_v47 = vsel %vm910_vm7, %v2686_v45, 0.0  ;;  %v2504_v29 = vpack.c.bf16 %v1302_v25, %v1299_v24  ;;  %v1306_v32 = vld [vmem:[%s3840_s11 + $0x78] sm:$0xff]  ;;  %v1535_v24 = vld [vmem:[%s3843_s14 + $0x88] sm:$0xff] }
 0x2f8   : > { %v2690_v48 = vpop.eup %2689  ;;  %v951_v49 = vsel %vm910_vm7, %v2688_v46, 0.0 }
 0x2f9   : > { %v2692_v50 = vpop.eup %2691  ;;  %v952_v51 = vadd.f32 %v951_v49, %v950_v47  ;;  %v953_v52 = vsel %vm910_vm7, %v2690_v48, 0.0  ;;  %v1060_v47 = vld [vmem:[%s3839_s10 + $0xb8] sm:$0xff] }
 0x2fa   : > { %v2694_v53 = vpop.eup %2693  ;;  %v955_v55 = vsel %vm910_vm7, %v2692_v50, 0.0 }
 0x2fb   : > { %v954_v54 = vadd.f32 %v953_v52, %v952_v51  ;;  %v3221_v57 = vpop.eup %2695  ;;  %v957_v60 = vsel %vm910_vm7, %v2694_v53, 0.0  ;;  %v1113_v51 = vld [vmem:[%s3839_s10 + $0x260] sm:$0xff]  ;;  %v1111_v52 = vld [vmem:[%s3839_s10 + $0x250] sm:$0xff] }
 0x2fc   : > { %v3224_v61 = vpop.eup %2697  ;;  %v959_v63 = vsel %vm910_vm7, %v3221_v57, 0.0 }
 0x2fd   : > { %v956_v58 = vadd.f32 %v955_v55, %v954_v54  ;;  %v3228_v0 = vpop.eup %2699  ;;  %v961_v2 = vsel %vm910_vm7, %v3224_v61, 0.0  ;;  %v1114_v54 = vld [vmem:[%s3839_s10 + $0x268] sm:$0xff]  ;;  %v1109_v55 = vld [vmem:[%s3839_s10 + $0x240] sm:$0xff] }
 0x2fe   : > { %v963_v4 = vsel %vm910_vm7, %v3228_v0, 0.0 }
 0x2ff   : > { %v958_v62 = vadd.f32 %v957_v60, %v956_v58  ;;  %v2452_v58 = vpack.c.bf16 %v1114_v54, %v1111_v52  ;;  %v978_v54 = vld [vmem:[%s3861_s3 + $0x20] sm:$0xff] }
 0x301   : > { %v960_v1 = vadd.f32 %v959_v63, %v958_v62  ;;  %v1063_v62 = vld [vmem:[%s3839_s10 + $0xd0] sm:$0xff]  ;;  %v1066_v63 = vld [vmem:[%s3839_s10 + $0xe8] sm:$0xff] }
 0x303   : > { %v962_v3 = vadd.f32 %v961_v2, %v960_v1  ;;  %v2454_v1 = vpack.c.bf16 %v1066_v63, %v1063_v62 }
 0x305   : > { %v964_v5 = vadd.f32 %v963_v4, %v962_v3  ;;  %v1116_v3 = vld [vmem:[%s3839_s10 + $0x278] sm:$0xff]  ;;  %v1119_v4 = vld [vmem:[%s3839_s10 + $0x290] sm:$0xff] }
 0x307   : > { %2701 = vrcp.f32 %v964_v5  ;;  %v1117_v5 = vld [vmem:[%s3839_s10 + $0x280] sm:$0xff] }
 0x311   : > { %v3234_v6 = vpop.eup %2701 }
 0x312   : > { %v967_v7 = vmul.f32 %v3234_v6, %v2688_v46  ;;  %v966_v8 = vmul.f32 %v3234_v6, %v2686_v45  ;;  %v968_v9 = vmul.f32 %v3234_v6, %v2690_v48  ;;  %v969_v23 = vmul.f32 %v3234_v6, %v2692_v50  ;;  %v1057_v46 = vld [vmem:[%s3839_s10 + $0xa0] sm:$0xff]  ;;  %v1110_v50 = vld [vmem:[%s3839_s10 + $0x248] sm:$0xff] }
 0x313   : > { %v970_v36 = vmul.f32 %v3234_v6, %v2694_v53  ;;  %v2418_v45 = vpack.c.bf16 %v1106_v43, %v1103_v42  ;;  %v2450_v48 = vpack.c.bf16 %v1060_v47, %v1057_v46  ;;  %v971_v49 = vmul.f32 %v3234_v6, %v3221_v57  ;;  %v1112_v57 = vld [vmem:[%s3839_s10 + $0x258] sm:$0xff] }
 0x314   : > { %989 = vperm.xlu1 %2668, %v967_v7   ;;  %984 = vperm.xlu0 %2667, %v966_v8   ;;  %v2420_v53 = vpack.c.bf16 %v1113_v51, %v1110_v50  ;;  %v2422_v60 = vpack.c.bf16 %v1112_v57, %v1109_v55  ;;  %v972_v2 = vmul.f32 %v3234_v6, %v3224_v61  ;;  %v1120_v61 = vld [vmem:[%s3839_s10 + $0x298] sm:$0xff]  ;;  %v1115_v8 = vld [vmem:[%s3839_s10 + $0x270] sm:$0xff] }
 0x315   : > { %2419 = vmatpush1.bf16.msra.mxu1 %v2418_v45  ;;  %2451 = vmatpush3.bf16.msra.mxu0 %v2450_v48  ;;  %v2424_v7 = vpack.c.bf16 %v1119_v4, %v1116_v3  ;;  %v2456_v10 = vpack.c.bf16 %v1120_v61, %v1117_v5  ;;  %v973_v16 = vmul.f32 %v3234_v6, %v3228_v0  ;;  %v1126_v0 = vld [vmem:[%s3839_s10 + $0x2c8] sm:$0xff]  ;;  %v1121_v6 = vld [vmem:[%s3839_s10 + $0x2a0] sm:$0xff]  ;;  %v976_v48 = vld [vmem:[%s3861_s3 + $0x10] sm:$0xff] }
 0x316   : > { %2421 = vmatprep.subr.bf16.mxu1 %v2420_v53  ;;  %2453 = vmatprep.subr.bf16.mxu0 %v2452_v58  ;;  %v2460_v22 = vpack.c.bf16 %v1126_v0, %v1123_v19  ;;  %v974_v45 = vld [vmem:[%s3861_s3] sm:$0xff]  ;;  %v977_v51 = vld [vmem:[%s3861_s3 + $0x18] sm:$0xff]  ;;  %v979_v58 = vld [vmem:[%s3861_s3 + $0x28] sm:$0xff] }
 0x317   : > { %v981_v61 = vld [vmem:[%s3861_s3 + $0x38] sm:$0xff] }
 0x318   : > { %994 = vperm.xlu1 %2668, %v968_v9   ;;  %v1118_v9 = vld [vmem:[%s3839_s10 + $0x288] sm:$0xff] }
 0x319   : > { %2423 = vmatpush1.bf16.msra.mxu1 %v2422_v60  ;;  %2455 = vmatpush3.bf16.msra.mxu0 %v2454_v1  ;;  %v2426_v11 = vpack.c.bf16 %v1118_v9, %v1115_v8  ;;  %v980_v1 = vld [vmem:[%s3861_s3 + $0x30] sm:$0xff]  ;;  %v1291_v9 = vld [vmem:[%s3840_s11] sm:$0xff] }
 0x31a   : > { %2425 = vmatprep.subr.bf16.mxu1 %v2424_v7  ;;  %2457 = vmatprep.subr.bf16.mxu0 %v2456_v10 }
 0x31c   : > { %999 = vperm.xlu1 %2668, %v969_v23   ;;  %v2430_v23 = vpack.c.bf16 %v1124_v21, %v1121_v6  ;;  %v2501_v6 = vpack.c.bf16 %v1296_v13, %v1293_v12  ;;  %v1297_v21 = vld [vmem:[%s3840_s11 + $0x30] sm:$0xff] }
 0x31d   : > { %2427 = vmatpush1.bf16.msra.mxu1 %v2426_v11  ;;  %2459 = vmatpush3.bf16.msra.mxu0 %v2458_v14  ;;  %v1294_v11 = vld [vmem:[%s3840_s11 + $0x18] sm:$0xff]  ;;  %v1337_v12 = vld [vmem:[%s3840_s11 + $0x170] sm:$0xff] }
 0x31e   : > { %2429 = vmatprep.subr.bf16.mxu1 %v2428_v20  ;;  %2461 = vmatprep.subr.bf16.mxu0 %v2460_v22  ;;  %v3466_v20 = vld [vmem:[#allocation3] sm:$0xff]  ;;  %v2470_v0 = vpack.c.bf16 %v1294_v11, %v1291_v9  ;;  %v2472_v22 = vpack.c.bf16 %v1301_v18, %v1298_v17  ;;  %v1329_v9 = vld [vmem:[%s3840_s11 + $0x130] sm:$0xff]  ;;  %v1334_v11 = vld [vmem:[%s3840_s11 + $0x158] sm:$0xff] }
 0x31f   : > { %v2496_v17 = vpack.c.bf16 %v1337_v12, %v1334_v11  ;;  %v1336_v18 = vld [vmem:[%s3840_s11 + $0x168] sm:$0xff] }
 0x320   : > { %1004 = vperm.xlu1 %2668, %v970_v36   ;;  %v1081_v36 = vld [vmem:[%s3839_s10 + $0x160] sm:$0xff] }
 0x321   : > { %2431 = vmatpush1.bf16.msra.mxu1 %v2430_v23  ;;  %2463 = vmatpush3.bf16.msra.mxu0 %v2462_v26  ;;  %v2466_v39 = vpack.c.bf16 %v1084_v37, %v1081_v36  ;;  %v1300_v23 = vld [vmem:[%s3840_s11 + $0x48] sm:$0xff]  ;;  %v1313_v36 = vld [vmem:[%s3840_s11 + $0xb0] sm:$0xff] }
 0x322   : > { %2433 = vmatprep.subr.bf16.mxu1 %v2432_v30  ;;  %2465 = vmatprep.subr.bf16.mxu0 %v2464_v34  ;;  %v1304_v26 = vld [vmem:[%s3840_s11 + $0x68] sm:$0xff]  ;;  %v2474_v28 = vpack.c.bf16 %v1300_v23, %v1297_v21  ;;  %v1303_v30 = vld [vmem:[%s3840_s11 + $0x60] sm:$0xff] }
 0x323   : > { %v2476_v31 = vpack.c.bf16 %v1307_v27, %v1304_v26  ;;  %v1308_v34 = vld [vmem:[%s3840_s11 + $0x88] sm:$0xff]  ;;  %v2478_v37 = vpack.c.bf16 %v1306_v32, %v1303_v30  ;;  %v1534_v23 = vld [vmem:[%s3843_s14 + $0x80] sm:$0xff]  ;;  %v1537_v27 = vld [vmem:[%s3843_s14 + $0x98] sm:$0xff] }
 0x324   : > { %1009 = vperm.xlu1 %2668, %v971_v49   ;;  %v2507_v38 = vpack.c.bf16 %v1308_v34, %v1305_v33  ;;  %v2524_v25 = vpack.c.bf16 %v1535_v24, %v1534_v23  ;;  %v1518_v26 = vld [vmem:[%s3843_s14] sm:$0xff]  ;;  %v1551_v32 = vld [vmem:[%s3843_s14 + $0x108] sm:$0xff]  ;;  %v1532_v24 = vld [vmem:[%s3843_s14 + $0x70] sm:$0xff] }
 0x325   : > { %2435 = vmatpush1.bf16.msra.mxu1 %v2434_v35  ;;  %2467 = vmatpush3.bf16.msra.mxu0 %v2466_v39  ;;  %v1310_v35 = vld [vmem:[%s3840_s11 + $0x98] sm:$0xff]  ;;  %v1309_v39 = vld [vmem:[%s3840_s11 + $0x90] sm:$0xff]  ;;  %v1538_v33 = vld [vmem:[%s3843_s14 + $0xa0] sm:$0xff] }
 0x326   : > { %2469 = vmatprep.subr.bf16.mxu1 %v2468_v41  ;;  %2500 = vmatprep.subr.bf16.mxu0 %v2779_v56  ;;  %v2480_v40 = vpack.c.bf16 %v1313_v36, %v1310_v35  ;;  %v1312_v41 = vld [vmem:[%s3840_s11 + $0xa8] sm:$0xff] }
 0x327   : > { %v1539_v36 = vld [vmem:[%s3843_s14 + $0xa8] sm:$0xff] }
 0x328   : > { %1014 = vperm.xlu1 %2668, %v972_v2  }
 0x32c   : > { %1019 = vperm.xlu1 %2668, %v973_v16  }
 0x393   : > { %v990_v42 = vpop.permute.xlu1 %989  ;;  %v985_v46 = vpop.permute.xlu0 %984 }
 0x394   : > { %v1023_v49 = vmul.f32 %v990_v42, %v975_v44  ;;  %v1022_v50 = vmul.f32 %v985_v46, %v974_v45  ;;  %v1311_v42 = vld [vmem:[%s3840_s11 + $0xa0] sm:$0xff]  ;;  %v1316_v44 = vld [vmem:[%s3840_s11 + $0xc8] sm:$0xff]  ;;  %v2482_v46 = vpack.c.bf16 %v1312_v41, %v1309_v39 }
 0x395   : > { %v1319_v45 = vld [vmem:[%s3840_s11 + $0xe0] sm:$0xff]  ;;  %v1523_v39 = vld [vmem:[%s3843_s14 + $0x28] sm:$0xff] }
 0x396   : > { %v1030_v55 = vadd.f32 %v1023_v49, %v1022_v50  ;;  %v2484_v49 = vpack.c.bf16 %v1319_v45, %v1316_v44  ;;  %v1318_v50 = vld [vmem:[%s3840_s11 + $0xd8] sm:$0xff]  ;;  %v1540_v44 = vld [vmem:[%s3843_s14 + $0xb0] sm:$0xff] }
 0x397   : > { %v995_v43 = vpop.permute.xlu1 %994  ;;  %v1541_v45 = vld [vmem:[%s3843_s14 + $0xb8] sm:$0xff] }
 0x398   : > { %v1024_v53 = vmul.f32 %v995_v43, %v976_v48  ;;  %v1314_v43 = vld [vmem:[%s3840_s11 + $0xb8] sm:$0xff]  ;;  %v1315_v48 = vld [vmem:[%s3840_s11 + $0xc0] sm:$0xff] }
 0x39a   : > { %v1031_v62 = vadd.f32 %v1030_v55, %v1024_v53  ;;  %v1322_v53 = vld [vmem:[%s3840_s11 + $0xf8] sm:$0xff]  ;;  %v2486_v55 = vpack.c.bf16 %v1318_v50, %v1315_v48 }
 0x39b   : > { %v1000_v47 = vpop.permute.xlu1 %999  ;;  %v1525_v48 = vld [vmem:[%s3843_s14 + $0x38] sm:$0xff] }
 0x39c   : > { %v1025_v57 = vmul.f32 %v1000_v47, %v977_v51  ;;  %v2510_v47 = vpack.c.bf16 %v1314_v43, %v1311_v42  ;;  %v1317_v51 = vld [vmem:[%s3840_s11 + $0xd0] sm:$0xff]  ;;  %v1553_v42 = vld [vmem:[%s3843_s14 + $0x118] sm:$0xff] }
 0x39e   : > { %v1032_v2 = vadd.f32 %v1031_v62, %v1025_v57  ;;  %v1324_v62 = vld [vmem:[%s3840_s11 + $0x108] sm:$0xff] }
 0x39f   : > { %v1005_v52 = vpop.permute.xlu1 %1004 }
 0x3a0   : > { %v1026_v63 = vmul.f32 %v1005_v52, %v978_v54  ;;  %v1320_v52 = vld [vmem:[%s3840_s11 + $0xe8] sm:$0xff]  ;;  %v1325_v54 = vld [vmem:[%s3840_s11 + $0x110] sm:$0xff] }
 0x3a1   : > { %v2513_v57 = vpack.c.bf16 %v1320_v52, %v1317_v51  ;;  %v1555_v51 = vld [vmem:[%s3843_s14 + $0x128] sm:$0xff] }
 0x3a2   : > { %v1033_v5 = vadd.f32 %v1032_v2, %v1026_v63  ;;  %v1323_v63 = vld [vmem:[%s3840_s11 + $0x100] sm:$0xff]  ;;  %v1328_v2 = vld [vmem:[%s3840_s11 + $0x128] sm:$0xff] }
 0x3a3   : > { %v1010_v60 = vpop.permute.xlu1 %1009 }
 0x3a4   : > { %v1027_v3 = vmul.f32 %v1010_v60, %v979_v58  ;;  %v1321_v58 = vld [vmem:[%s3840_s11 + $0xf0] sm:$0xff]  ;;  %v2488_v60 = vpack.c.bf16 %v1325_v54, %v1322_v53  ;;  %v1542_v53 = vld [vmem:[%s3843_s14 + $0xc0] sm:$0xff]  ;;  %v1543_v54 = vld [vmem:[%s3843_s14 + $0xc8] sm:$0xff] }
 0x3a6   : > { %v1034_v8 = vadd.f32 %v1033_v5, %v1027_v3  ;;  %v1331_v3 = vld [vmem:[%s3840_s11 + $0x140] sm:$0xff] }
 0x3a7   : > { %v1015_v4 = vpop.permute.xlu1 %1014 }
 0x3a8   : > { %v1028_v7 = vmul.f32 %v1015_v4, %v980_v1  ;;  %v1326_v1 = vld [vmem:[%s3840_s11 + $0x118] sm:$0xff]  ;;  %v2490_v4 = vpack.c.bf16 %v1324_v62, %v1321_v58  ;;  %v1527_v58 = vld [vmem:[%s3843_s14 + $0x48] sm:$0xff] }
 0x3a9   : > { %v2516_v5 = vpack.c.bf16 %v1326_v1, %v1323_v63  ;;  %v1557_v62 = vld [vmem:[%s3843_s14 + $0x138] sm:$0xff] }
 0x3aa   : > { %v1035_v14 = vadd.f32 %v1034_v8, %v1028_v7  ;;  %v1327_v7 = vld [vmem:[%s3840_s11 + $0x120] sm:$0xff]  ;;  %v1330_v8 = vld [vmem:[%s3840_s11 + $0x138] sm:$0xff] }
 0x3ab   : > { %v1020_v10 = vpop.permute.xlu1 %1019  ;;  %v2494_v13 = vpack.c.bf16 %v1330_v8, %v1327_v7  ;;  %v1529_v7 = vld [vmem:[%s3843_s14 + $0x58] sm:$0xff]  ;;  %v1559_v8 = vld [vmem:[%s3843_s14 + $0x148] sm:$0xff] }
 0x3ac   : > { %v1029_v16 = vmul.f32 %v1020_v10, %v981_v61  ;;  %v2492_v61 = vpack.c.bf16 %v1331_v3, %v1328_v2  ;;  %v1332_v10 = vld [vmem:[%s3840_s11 + $0x148] sm:$0xff]  ;;  %v1544_v2 = vld [vmem:[%s3843_s14 + $0xd0] sm:$0xff]  ;;  %v1545_v3 = vld [vmem:[%s3843_s14 + $0xd8] sm:$0xff] }
 0x3ae   : > { %v3464_v19 = vadd.f32 %v1035_v14, %v1029_v16  ;;  %v2519_v14 = vpack.c.bf16 %v1332_v10, %v1329_v9  ;;  %v1333_v16 = vld [vmem:[%s3840_s11 + $0x150] sm:$0xff]  ;;  %v1546_v9 = vld [vmem:[%s3843_s14 + $0xe0] sm:$0xff]  ;;  %v1547_v10 = vld [vmem:[%s3843_s14 + $0xe8] sm:$0xff] }
 0x3af   : > { %v2498_v21 = vpack.c.bf16 %v1336_v18, %v1333_v16  ;;  %v1531_v16 = vld [vmem:[%s3843_s14 + $0x68] sm:$0xff]  ;;  %v1561_v18 = vld [vmem:[%s3843_s14 + $0x158] sm:$0xff] }
 0x3b0   : > { %1214 = vmatprep.mubr.f32.mxu1 %v3464_v19  ;;  %1285 = vmatprep.mubr.f32.mxu0 %v3464_v19 }
 0x3b1   : > { %1215 = vmatmul.mubr.f32.vlgmr.msra.gmra.mrb[0].mxu1 %v3466_v20  ;;  %1286 = vmatmul.mubr.f32.vlgmr.msra.gmra.mrb[2].mxu0 %v3466_v20 }
 0x3b2   : > { %2471 = vmatpush1.bf16.msra.mxu1 %v2470_v0  ;;  %2502 = vmatpush3.bf16.msra.mxu0 %v2501_v6  ;;  %v1335_v0 = vld [vmem:[%s3840_s11 + $0x160] sm:$0xff]  ;;  %v1338_v6 = vld [vmem:[%s3840_s11 + $0x178] sm:$0xff] }
 0x3b3   : > { %2473 = vmatprep.subr.bf16.mxu1 %v2472_v22  ;;  %2503 = vmatprep.subr.bf16.mxu0 %v2779_v56  ;;  %v2522_v22 = vpack.c.bf16 %v1338_v6, %v1335_v0  ;;  %v1548_v0 = vld [vmem:[%s3843_s14 + $0xf0] sm:$0xff]  ;;  %v1549_v6 = vld [vmem:[%s3843_s14 + $0xf8] sm:$0xff] }
 0x3b4   : > { %1420 = vmatprep.mubr.f32.mxu1 %v2781_v59  ;;  %2243 = vmatprep.mubr.msk.f32.mxu0 %vm2780_vm1, %v2781_v59  ;;  %v2552_v23 = vpack.c.bf16 %v1549_v6, %v1548_v0 }
 0x3b6   : > { %2475 = vmatpush1.bf16.msra.mxu1 %v2474_v28  ;;  %2505 = vmatpush3.bf16.msra.mxu0 %v2504_v29  ;;  %v1520_v28 = vld [vmem:[%s3843_s14 + $0x10] sm:$0xff]  ;;  %v1521_v29 = vld [vmem:[%s3843_s14 + $0x18] sm:$0xff] }
 0x3b7   : > { %2477 = vmatprep.subr.bf16.mxu1 %v2476_v31  ;;  %2506 = vmatprep.subr.bf16.mxu0 %v2779_v56  ;;  %v1550_v31 = vld [vmem:[%s3843_s14 + $0x100] sm:$0xff]  ;;  %v2530_v34 = vpack.c.bf16 %v1521_v29, %v1520_v28  ;;  %v1565_v28 = vld [vmem:[%s3843_s14 + $0x178] sm:$0xff] }
 0x3b8   : > { %v2557_v35 = vpack.c.bf16 %v1551_v32, %v1550_v31 }
 0x3ba   : > { %2479 = vmatpush1.bf16.msra.mxu1 %v2478_v37  ;;  %2508 = vmatpush3.bf16.msra.mxu0 %v2507_v38  ;;  %v2532_v37 = vpack.c.bf16 %v1539_v36, %v1538_v33  ;;  %v1522_v38 = vld [vmem:[%s3843_s14 + $0x20] sm:$0xff]  ;;  %v1135_v33 = vlaneseq }
 0x3bb   : > { %2481 = vmatprep.subr.bf16.mxu1 %v2480_v40  ;;  %2509 = vmatprep.subr.bf16.mxu0 %v2779_v56  ;;  %v1552_v40 = vld [vmem:[%s3843_s14 + $0x110] sm:$0xff]  ;;  %v2534_v41 = vpack.c.bf16 %v1523_v39, %v1522_v38  ;;  %v1133_v36 = vld [vmem:[%s3841_s12] sm:$0x7] }
 0x3bc   : > { %v2560_v43 = vpack.c.bf16 %v1553_v42, %v1552_v40  ;;  %v3770_v0 = vand.u32 127, %v1135_v33 }
 0x3be   : > { %2483 = vmatpush1.bf16.msra.mxu1 %v2482_v46  ;;  %2511 = vmatpush3.bf16.msra.mxu0 %v2510_v47  ;;  %v2536_v46 = vpack.c.bf16 %v1541_v45, %v1540_v44  ;;  %v1524_v47 = vld [vmem:[%s3843_s14 + $0x30] sm:$0xff] }
 0x3bf   : > { %2485 = vmatprep.subr.bf16.mxu1 %v2484_v49  ;;  %2512 = vmatprep.subr.bf16.mxu0 %v2779_v56  ;;  %v1554_v49 = vld [vmem:[%s3843_s14 + $0x120] sm:$0xff]  ;;  %v2538_v50 = vpack.c.bf16 %v1525_v48, %v1524_v47 }
 0x3c0   : > { %v2563_v52 = vpack.c.bf16 %v1555_v51, %v1554_v49 }
 0x3c2   : > { %2487 = vmatpush1.bf16.msra.mxu1 %v2486_v55  ;;  %2514 = vmatpush3.bf16.msra.mxu0 %v2513_v57  ;;  %v1526_v55 = vld [vmem:[%s3843_s14 + $0x40] sm:$0xff]  ;;  %v2540_v57 = vpack.c.bf16 %v1543_v54, %v1542_v53 }
 0x3c3   : > { %2489 = vmatprep.subr.bf16.mxu1 %v2488_v60  ;;  %2515 = vmatprep.subr.bf16.mxu0 %v2779_v56  ;;  %v1556_v60 = vld [vmem:[%s3843_s14 + $0x130] sm:$0xff]  ;;  %v2542_v63 = vpack.c.bf16 %v1527_v58, %v1526_v55 }
 0x3c4   : > { %v2566_v1 = vpack.c.bf16 %v1557_v62, %v1556_v60 }
 0x3c6   : > { %2491 = vmatpush1.bf16.msra.mxu1 %v2490_v4  ;;  %2517 = vmatpush3.bf16.msra.mxu0 %v2516_v5  ;;  %v1528_v4 = vld [vmem:[%s3843_s14 + $0x50] sm:$0xff]  ;;  %v2544_v5 = vpack.c.bf16 %v1545_v3, %v1544_v2 }
 0x3c7   : > { %2493 = vmatprep.subr.bf16.mxu1 %v2492_v61  ;;  %2518 = vmatprep.subr.bf16.mxu0 %v2779_v56  ;;  %v1558_v61 = vld [vmem:[%s3843_s14 + $0x140] sm:$0xff]  ;;  %v2546_v11 = vpack.c.bf16 %v1529_v7, %v1528_v4 }
 0x3c8   : > { %v2569_v12 = vpack.c.bf16 %v1559_v8, %v1558_v61  ;;  %v2713_v61 = vld [vmem:[#allocation2] sm:$0xff] }
 0x3ca   : > { %2495 = vmatpush1.bf16.msra.mxu1 %v2494_v13  ;;  %2520 = vmatpush3.bf16.msra.mxu0 %v2519_v14  ;;  %v2548_v13 = vpack.c.bf16 %v1547_v10, %v1546_v9  ;;  %v1530_v14 = vld [vmem:[%s3843_s14 + $0x60] sm:$0xff] }
 0x3cb   : > { %2497 = vmatprep.subr.bf16.mxu1 %v2496_v17  ;;  %2521 = vmatprep.subr.bf16.mxu0 %v2779_v56  ;;  %v1560_v17 = vld [vmem:[%s3843_s14 + $0x150] sm:$0xff] }
 0x3ce   : > { %2499 = vmatpush1.bf16.msra.mxu1 %v2498_v21  ;;  %2523 = vmatpush3.bf16.msra.mxu0 %v2522_v22  ;;  %v2550_v21 = vpack.c.bf16 %v1531_v16, %v1530_v14  ;;  %v2572_v22 = vpack.c.bf16 %v1561_v18, %v1560_v17  ;;  %v1963_v14 = vld [vmem:[%s3844_s15] ss:$0 sm:$0xff] }
 0x3cf   : > { %2556 = vmatprep.subr.bf16.mxu1 %v2779_v56  ;;  %2525 = vmatprep.subr.bf16.mxu0 %v2524_v25  ;;  %v1533_v25 = vld [vmem:[%s3843_s14 + $0x78] sm:$0xff] }
 0x3d1   : > { %1421 = vmatmul.mubr.f32.vlgmr.msra.gmra.mrb[0].mxu1 %v3059_v15  ;;  %2244 = vmatmul.mubr.f32.vlgmr.msra.gmra.mrb[4].mxu0 %v3059_v15  ;;  %v1519_v15 = vld [vmem:[%s3843_s14 + $0x8] sm:$0xff] }
 0x3d2   : > { %1637 = vmatprep.mubr.f32.mxu0 %v3464_v19  ;;  %2278 = vmatprep.mubr.msk.f32.mxu1 %vm2780_vm1, %v2781_v59  ;;  %v1536_v59 = vld [vmem:[%s3843_s14 + $0x90] sm:$0xff]  ;;  %v2526_v19 = vpack.c.bf16 %v1519_v15, %v1518_v26  ;;  %v1562_v26 = vld [vmem:[%s3843_s14 + $0x160] sm:$0xff]  ;;  %v1563_v15 = vld [vmem:[%s3843_s14 + $0x168] sm:$0xff] }
 0x3d3   : > { %v2528_v30 = vpack.c.bf16 %v1537_v27, %v1536_v59  ;;  %2558 = vmatpush3.bf16.msra.mxu1 %v2557_v35  ;;  %v2554_v59 = vpack.c.bf16 %v1533_v25, %v1532_v24  ;;  %v1564_v27 = vld [vmem:[%s3843_s14 + $0x170] sm:$0xff] }
 0x3d4   : > { %2527 = vmatpush3.bf16.msra.mxu0 %v2526_v19  ;;  %2559 = vmatprep.subr.bf16.mxu1 %v2779_v56  ;;  %v2575_v19 = vpack.c.bf16 %v1563_v15, %v1562_v26  ;;  %v2578_v29 = vpack.c.bf16 %v1565_v28, %v1564_v27 }
 0x3d5   : > { %2529 = vmatprep.subr.bf16.mxu0 %v2528_v30 }
 0x3d7   : > { %2561 = vmatpush3.bf16.msra.mxu1 %v2560_v43 }
 0x3d8   : > { %2531 = vmatpush3.bf16.msra.mxu0 %v2530_v34  ;;  %2562 = vmatprep.subr.bf16.mxu1 %v2779_v56  ;;  %v1136_v34 = vshrl.u32 %v1135_v33, 7 }
 0x3d9   : > { %2533 = vmatprep.subr.bf16.mxu0 %v2532_v37  ;;  %v1339_v37 = vld [vmem:[%s3842_s13] sm:$0x7] }
 0x3da   : > { %v1137_v35 = vsub.s32 0, %v1136_v34  ;;  %v1141_v38 = vsub.s32 1, %v1136_v34  ;;  %v1145_v53 = vsub.s32 2, %v1136_v34 }
 0x3db   : > { %2564 = vmatpush3.bf16.msra.mxu1 %v2563_v52 }
 0x3dc   : > { %2535 = vmatpush3.bf16.msra.mxu0 %v2534_v41  ;;  %2565 = vmatprep.subr.bf16.mxu1 %v2779_v56  ;;  %v1138_v39 = vrot.slane %v1133_v36, %v1137_v35  ;;  %v1142_v40 = vrot.slane %v1133_v36, %v1141_v38  ;;  %v1348_v41 = vrot.slane %v1339_v37, %v1141_v38 }
 0x3dd   : > { %2537 = vmatprep.subr.bf16.mxu0 %v2536_v46  ;;  %v1352_v54 = vrot.slane %v1339_v37, %v1145_v53 }
 0x3de   : > { %v2622_v43 = vadd.f32 %v1348_v41, %v1142_v40 }
 0x3df   : > { %2567 = vmatpush3.bf16.msra.mxu1 %v2566_v1 }
 0x3e0   : > { %2539 = vmatpush3.bf16.msra.mxu0 %v2538_v50  ;;  %2568 = vmatprep.subr.bf16.mxu1 %v2779_v56 }
 0x3e1   : > { %2541 = vmatprep.subr.bf16.mxu0 %v2540_v57  ;;  %v1146_v57 = vrot.slane %v1133_v36, %v1145_v53 }
 0x3e3   : > { %2570 = vmatpush3.bf16.msra.mxu1 %v2569_v12 }
 0x3e4   : > { %2543 = vmatpush3.bf16.msra.mxu0 %v2542_v63  ;;  %2571 = vmatprep.subr.bf16.mxu1 %v2779_v56 }
 0x3e5   : > { %2545 = vmatprep.subr.bf16.mxu0 %v2544_v5 }
 0x3e7   : > { %2573 = vmatpush3.bf16.msra.mxu1 %v2572_v22 }
 0x3e8   : > { %2547 = vmatpush3.bf16.msra.mxu0 %v2546_v11  ;;  %2574 = vmatprep.subr.bf16.mxu1 %v2779_v56 }
 0x3e9   : > { %2549 = vmatprep.subr.bf16.mxu0 %v2548_v13 }
 0x3eb   : > { %2576 = vmatpush3.bf16.msra.mxu1 %v2575_v19 }
 0x3ec   : > { %2551 = vmatpush3.bf16.msra.mxu0 %v2550_v21  ;;  %2577 = vmatprep.subr.bf16.mxu1 %v2779_v56  ;;  %v1344_v56 = vrot.slane %v1339_v37, %v1137_v35 }
 0x3ed   : > { %2553 = vmatprep.subr.bf16.mxu0 %v2552_v23 }
 0x3ef   : > { %2579 = vmatpush3.bf16.msra.mxu1 %v2578_v29 }
 0x3f0   : > { %2555 = vmatpush3.bf16.msra.mxu0 %v2554_v59 }
 0x3f2   : > { %2279 = vmatmul.mubr.f32.vlgmr.msra.gmra.mrb[2].mxu1 %v3466_v20  ;;  %v2620_v20 = vadd.f32 %v1344_v56, %v1138_v39 }
 0x484   : > { %v2043_v30 = vpop.f32.mrb[2].mxu0 }
 0x485   : > { %v2044_v31 = vpop.f32.mrb[3].mxu0 }
 0x486   : > { %v2045_v32 = vadd.f32 %v2044_v31, %v2043_v30  ;;  %v1741_v30 = vld [vmem:[%s2953_s23] sm:$0xff] (!%p1964_p6) }
 0x487   : > { %1742 = vst [vmem:[#allocation3] sm:$0xff] (!%p1964_p6), %v1741_v30 }
 0x488   : > { %v1288_v63 = vadd.f32 %v2045_v32, %v1146_v57 }
 0x4a4   : > { %v1422_v42 = vpop.f32.mrb[0].mxu1  ;;  %v1493_v44 = vpop.f32.mrb[4].mxu0 }
 0x4a5   : > { %v2621_v45 = vadd.f32 %v2620_v20, %v1422_v42  ;;  %v1424_v46 = vpop.f32.mrb[1].mxu1  ;;  %v2245_v47 = vpop.f32.mrb[5].mxu0  ;;  %v1494_v60 = vadd.f32 %v1493_v44, %v1352_v54 }
 0x4a6   : > { %v2623_v49 = vadd.f32 %v2622_v43, %v1424_v46 }
 0x4a7   : > { %v1961_v48 = vmul.f32 -1.442695, %v2621_v45 }
 0x4a8   : > { %v1962_v50 = vmul.f32 -1.442695, %v2623_v49 }
 0x4a9   : > { %2703 = vpow2.f32 %v1961_v48 }
 0x4aa   : > { %2705 = vpow2.f32 %v1962_v50 }
 0x4b3   : > { %v2704_v51 = vpop.eup %2703 }
 0x4b4   : > { %v1501_v52 = vadd.f32 1.0, %v2704_v51  ;;  %v2706_v55 = vpop.eup %2705 }
 0x4b5   : > { %v1508_v58 = vadd.f32 1.0, %v2706_v55 }
 0x4b6   : > { %2707 = vrcp.f32 %v1501_v52 }
 0x4b7   : > { %2709 = vrcp.f32 %v1508_v58 }
 0x4c0   : > { %v2708_v62 = vpop.eup %2707 }
 0x4c1   : > { %v1511_v1 = vmul.f32 %v2708_v62, %v1494_v60  ;;  %v2710_v3 = vpop.eup %2709 }
 0x4c2   : > { %v1514_v4 = vsub.f32 1.0, %v2710_v3  ;;  %v1516_v8 = vmul.f32 %v2713_v61, %v2710_v3 }
 0x4c3   : > { %v1512_v2 = vadd.f32 %v1511_v1, %v1288_v63 }
 0x4c5   : > { %2711 = vtanh.f32 %v1512_v2  ;;  %v1709_v10 = vpop.f32.mrb[2].mxu1 }
 0x4c6   : > { %v2280_v11 = vpop.f32.mrb[3].mxu1 }
 0x4cf   : > { %v2712_v5 = vpop.eup %2711 }
 0x4d0   : > { %v1515_v7 = vmul.f32 %v2712_v5, %v1514_v4 }
 0x4d2   : > { %v1517_v9 = vadd.f32 %v1516_v8, %v1515_v7 }
 0x4d4   : > { %1638 = vmatmul.mubr.f32.vlgmr.msra.gmra.mrb[6].mxu0 %v1517_v9  ;;  %1735 = vst [vmem:[#allocation2] sm:$0xff] %v1517_v9 }
 0x5a7   : > { %v2095_v12 = vpop.f32.mrb[6].mxu0 }
 0x5a8   : > { %v2096_v13 = vpop.f32.mrb[7].mxu0 }
 0x5a9   : > { %v2097_v16 = vadd.f32 %v2096_v13, %v2095_v12 }
 0x5ab   : > { %v1640_v17 = vadd.f32 %v2097_v16, %v1963_v14 }
 0x5ad   : > { %v1710_v18 = vadd.f32 %v1709_v10, %v1640_v17 }
 0x5af   : > { %1713 = vst [vmem:[%s2958_s0] sm:$0xff] %v1710_v18  ;;  %1716 = vmax.xlane.f32.xlu1 %v1710_v18 }
 0x63c   : > { %v1717_v6 = vpop.xlane.xlu1 %1716 }
 0x63d   : > { %vm1718_vm11 = vcmp.eq.f32.partialorder %v1710_v18, %v1717_v6 }
 0x63e   : > { %v1719_v21 = vsel %vm1718_vm11, %v3770_v0, 128 }
 0x63f   : > { %v1721_v22 = vshra.s32 %v1719_v21, 16  ;;  %v1720_v24 = vand.u32 65535, %v1719_v21 }
 0x641   : > { %v1723_v23 = vcvt.s32.f32 %v1721_v22  ;;  %v1722_v26 = vcvt.s32.f32 %v1720_v24 }
 0x643   : > { %1724 = vmin.xlane.f32.xlu0 %v1723_v23 }
 0x6d0   : > { %v1725_v25 = vpop.xlane.xlu0 %1724 }
 0x6d1   : > { %vm1726_vm12 = vcmp.eq.f32.partialorder %v1723_v23, %v1725_v25  ;;  %v1731_v59 = vcvt.f32.s32 %v1725_v25 }
 0x6d2   : > { %v1727_v15 = vsel %vm1726_vm12, %v1722_v26, inf }
 0x6d3   : > { %1728 = vmin.xlane.f32.xlu0 %v1727_v15  ;;  %v1732_v27 = vshll.u32 %v1731_v59, 16 }
 0x75f   : > { %1740 = sbr.rel (%p1964_p6) target bundleno = 1894 (0x766), region = 104 }
 0x760   : > { %v1729_v19 = vpop.xlane.xlu0 %1728 }
 0x761   : > { %v1730_v28 = vcvt.f32.s32 %v1729_v19 }
 0x763   : > { %v1733_v29 = vadd.s32 %v1732_v27, %v1730_v28 }
 0x765   : > { %1734 = vst.msk [vmem:[%s2963_s1] sm:$0xff] %vm910_vm7, %v1733_v29 }
 0x766 PF: > { %p1965_p8 = scmp.gt.s32.totalorder %s1736_s19, 0 }
 0x767   : > { %v1750_v31 = vld [vmem:[%s3834_s5] sm:$0xff] (!%p1965_p8)  ;;  %v1751_v32 = vld [vmem:[%s3834_s5 + $0x8] sm:$0xff] (!%p1965_p8)  ;;  %v1752_v33 = vld [vmem:[%s3834_s5 + $0x10] sm:$0xff] (!%p1965_p8)  ;;  %v2783_v34 = vmov (!%p1965_p8), 0.0|0.0   ;;  %vm2784_vm13 = vmmov (!%p1965_p8), 0   ;;  %v2785_v37 = vmov (!%p1965_p8), 0.0   ;;  %vm1747_vm14 = vcmp.eq.s32.totalorder (!%p1965_p8), %v3770_v0, %v1733_v29 }
 0x768   : > { %1746 = sbr.rel (%p1965_p8) target bundleno = 2142 (0x85e), region = 108  ;;  %2580 = vmatprep.subr.bf16.mxu0 (!%p1965_p8), %v2783_v34  ;;  %v2581_v35 = vpack.c.bf16 (!%p1965_p8), %v1751_v32, %v1750_v31  ;;  %v1753_v36 = vld [vmem:[%s3834_s5 + $0x18] sm:$0xff] (!%p1965_p8)  ;;  %2313 = vmatprep.mubr.msk.f32.mxu0 (!%p1965_p8), %vm2784_vm13, %v2785_v37  ;;  %v1754_v39 = vld [vmem:[%s3834_s5 + $0x20] sm:$0xff] (!%p1965_p8)  ;;  %v1755_v56 = vld [vmem:[%s3834_s5 + $0x28] sm:$0xff] (!%p1965_p8)  ;;  %v2786_v55 = vmov (!%p1965_p8), 1.0  }
 0x769   : > { %v2584_v38 = vpack.c.bf16 (!%p1965_p8), %v1753_v36, %v1752_v33  ;;  %v2587_v40 = vpack.c.bf16 (!%p1965_p8), %v1755_v56, %v1754_v39  ;;  %v1756_v41 = vld [vmem:[%s3834_s5 + $0x30] sm:$0xff] (!%p1965_p8)  ;;  %v1757_v20 = vld [vmem:[%s3834_s5 + $0x38] sm:$0xff] (!%p1965_p8)  ;;  %v1758_v43 = vld [vmem:[%s3834_s5 + $0x40] sm:$0xff] (!%p1965_p8) }
 0x76a   : > { %2582 = vmatpush3.bf16.msra.mxu0 (!%p1965_p8), %v2581_v35  ;;  %v2590_v42 = vpack.c.bf16 (!%p1965_p8), %v1757_v20, %v1756_v41  ;;  %v1759_v44 = vld [vmem:[%s3834_s5 + $0x48] sm:$0xff] (!%p1965_p8)  ;;  %v1760_v46 = vld [vmem:[%s3834_s5 + $0x50] sm:$0xff] (!%p1965_p8)  ;;  %v1761_v47 = vld [vmem:[%s3834_s5 + $0x58] sm:$0xff] (!%p1965_p8) }
 0x76b   : > { %2583 = vmatprep.subr.bf16.mxu0 (!%p1965_p8), %v2783_v34  ;;  %v2593_v45 = vpack.c.bf16 (!%p1965_p8), %v1759_v44, %v1758_v43  ;;  %v2596_v48 = vpack.c.bf16 (!%p1965_p8), %v1761_v47, %v1760_v46  ;;  %v1762_v49 = vld [vmem:[%s3834_s5 + $0x60] sm:$0xff] (!%p1965_p8)  ;;  %v1763_v50 = vld [vmem:[%s3834_s5 + $0x68] sm:$0xff] (!%p1965_p8)  ;;  %v1764_v52 = vld [vmem:[%s3834_s5 + $0x70] sm:$0xff] (!%p1965_p8) }
 0x76c   : > { %v2599_v51 = vpack.c.bf16 (!%p1965_p8), %v1763_v50, %v1762_v49  ;;  %v1765_v53 = vld [vmem:[%s3834_s5 + $0x78] sm:$0xff] (!%p1965_p8) }
 0x76d   : > { %v2602_v54 = vpack.c.bf16 (!%p1965_p8), %v1765_v53, %v1764_v52 }
 0x76e   : > { %2585 = vmatpush3.bf16.msra.mxu0 (!%p1965_p8), %v2584_v38 }
 0x76f   : > { %2586 = vmatprep.subr.bf16.mxu0 %v2783_v34 }
 0x772   : > { %2588 = vmatpush3.bf16.msra.mxu0 %v2587_v40 }
 0x773   : > { %2589 = vmatprep.subr.bf16.mxu0 %v2783_v34 }
 0x776   : > { %2591 = vmatpush3.bf16.msra.mxu0 %v2590_v42 }
 0x777   : > { %2592 = vmatprep.subr.bf16.mxu0 %v2783_v34 }
 0x77a   : > { %2594 = vmatpush3.bf16.msra.mxu0 %v2593_v45 }
 0x77b   : > { %2595 = vmatprep.subr.bf16.mxu0 %v2783_v34 }
 0x77e   : > { %2597 = vmatpush3.bf16.msra.mxu0 %v2596_v48 }
 0x77f   : > { %2598 = vmatprep.subr.bf16.mxu0 %v2783_v34 }
 0x782   : > { %2600 = vmatpush3.bf16.msra.mxu0 %v2599_v51 }
 0x783   : > { %2601 = vmatprep.subr.bf16.mxu0 %v2783_v34 }
 0x786   : > { %2603 = vmatpush3.bf16.msra.mxu0 %v2602_v54 }
 0x789   : > { %2314 = vmatmul.mubr.msk.f32.vlgmr.msra.gmra.mrb[0].mxu0 %vm1747_vm14, %v2786_v55 }
 0x85c   : > { %v1832_v57 = vpop.f32.mrb[0].mxu0 }
 0x85d   : > { %1836 = vst [vmem:[#allocation3] sm:$0xff] %v1832_v57  ;;  %v2315_v58 = vpop.f32.mrb[1].mxu0 }
 0x85e PF: > { %s30_s24 = sadd.s32 1, %s2771_s24  }
 0x85f   : > { %p27_p7 = scmp.ge.s32.totalorder %s30_s24, 10  }
 0x861   :  { %29 = sbr.rel (!%p27_p7) target bundleno = 7 (0x7), region = 152 }
 0x868   :  { %1870 = vsyncpa [#allocation6], 1 }
 0x869   :  { %1872 = vsyncpa [#allocation6 + $0x1], 1 }
 0x86a   :  { %1873 = vsyncpa [#allocation7], 1 }
 0x86b   :  { %1875 = vsyncpa [#allocation7 + $0x1], 1 }

</bundles_post_ra>
